<compile_context>
chip_gen: v7x
topology: tpu7x:2x2x1
jax: 0.10.0
libtpu: 0.0.40
codegen_flags: <defaults>
</compile_context>

<pallas_src>
import functools

import jax
import jax.numpy as jnp
from jax import lax
from jax.experimental import pallas as pl
from jax.experimental.pallas import tpu as pltpu


def _lstm_recurrent_kernel(gx_ref, w_hh_ref, y_ref, h_out_ref, c_out_ref,
                           h_sc, c_sc, *, seq_len, needs_mask, n_streams):
    """One (batch-block, time-chunk) grid step of the LSTM recurrence.

    gx_ref   : (TC, Bb, 4H) bf16  precomputed x @ W_ih^T + (b_ih+b_hh), chunk
    w_hh_ref : (H, 4H)      bf16  recurrent weights (resident across the grid)
    y_ref    : (TC, Bb, H)        per-step hidden-state outputs for this chunk
    h_out_ref: (Bb, H)            final hidden state (written on last chunk)
    c_out_ref: (Bb, H)            final cell state   (written on last chunk)
    h_sc,c_sc: (Bb, H) f32        recurrent carry across time chunks
    """
    tc = gx_ref.shape[0]
    Bb, H = h_sc.shape
    t = pl.program_id(1)            # time-chunk index (grid axis 1)
    nt = pl.num_programs(1)

    @pl.when(t == 0)
    def _init():
        h_sc[...] = jnp.zeros_like(h_sc)
        c_sc[...] = jnp.zeros_like(c_sc)

    w_hh = w_hh_ref[...]            # bf16, resident in VMEM

    def cell(gx_s, h, c):
        # Native bf16 MXU matmul with f32 accumulation; gate math stays f32.
        z = gx_s + jnp.dot(h.astype(w_hh.dtype), w_hh,
                           preferred_element_type=jnp.float32)
        # TODO(synk): gate slices are whole lane tiles only when H % 128 == 0;
        #             small demo H uses masked lane selects (correct, slower).
        i_g = jax.nn.sigmoid(z[:, 0 * H:1 * H])
        f_g = jax.nn.sigmoid(z[:, 1 * H:2 * H])
        g_g = jnp.tanh(z[:, 2 * H:3 * H])
        o_g = jax.nn.sigmoid(z[:, 3 * H:4 * H])
        c_new = f_g * c + i_g * g_g
        h_new = o_g * jnp.tanh(c_new)
        return h_new, c_new

    # n_streams independent half-batch recurrences: their MXU / gate-math
    # chains are independent, so the VLIW scheduler can overlap one stream's
    # matmul with the other stream's sigmoid/tanh.
    rows = Bb // n_streams
    h0 = h_sc[...]
    c0 = c_sc[...]
    hs0 = tuple(h0[k * rows:(k + 1) * rows] for k in range(n_streams))
    cs0 = tuple(c0[k * rows:(k + 1) * rows] for k in range(n_streams))

    def step(s, carry):
        hs, cs = carry
        gx_s = gx_ref[s].astype(jnp.float32)          # (Bb, 4H)
        new_hs, new_cs = [], []
        for k in range(n_streams):
            h_new, c_new = cell(gx_s[k * rows:(k + 1) * rows], hs[k], cs[k])
            if needs_mask:
                # Padded tail steps must not advance the carry.
                valid = (t * tc + s) < seq_len
                h_new = jnp.where(valid, h_new, hs[k])
                c_new = jnp.where(valid, c_new, cs[k])
            if n_streams == 1:
                y_ref[s] = h_new.astype(y_ref.dtype)
            else:
                y_ref[s, k * rows:(k + 1) * rows, :] = h_new.astype(y_ref.dtype)
            new_hs.append(h_new)
            new_cs.append(c_new)
        return tuple(new_hs), tuple(new_cs)

    unroll = True if tc <= 8 else 8
    hs, cs = lax.fori_loop(0, tc, step, (hs0, cs0), unroll=unroll)

    for k in range(n_streams):
        sl = slice(k * rows, (k + 1) * rows)
        h_sc[sl, :] = hs[k]
        c_sc[sl, :] = cs[k]

    # h_n/c_n are resident accumulators: store only once, on the final chunk.
    @pl.when(t == nt - 1)
    def _finalize():
        for k in range(n_streams):
            sl = slice(k * rows, (k + 1) * rows)
            h_out_ref[sl, :] = hs[k].astype(h_out_ref.dtype)
            c_out_ref[sl, :] = cs[k].astype(c_out_ref.dtype)


def _physical_vmem_bytes():
    """Per-core physical VMEM; falls back to the smallest part (v7x, 64 MiB)."""
    default = 64 * 1024 * 1024
    try:
        info = pltpu.get_tpu_info()
        for attr in ("vmem_capacity_bytes", "vmem_size_bytes", "vmem_bytes"):
            v = getattr(info, attr, None)
            if v:
                return int(v)
    except Exception:
        pass
    return default


def lstm_recurrence_pallas(gx, w_hh_t, *, out_dtype, state_dtype,
                           time_chunk=32):
    """Sequential LSTM recurrence over precomputed input gates.

    gx     : (T, B, 4H) bf16 time-major, = x @ W_ih^T + (b_ih + b_hh)
    w_hh_t : (H, 4H) bf16 recurrent weights, transposed for `h @ W` layout
    Returns (y (T, B, H) time-major, h_n (B, H), c_n (B, H)).
    """
    T, B, G = gx.shape
    H = w_hh_t.shape[0]
    assert G == 4 * H

    # Time chunking without an exact-divisor requirement: pick ~time_chunk
    # steps per chunk, pad the (rare) tail chunk and mask its carry updates.
    num_chunks = -(-T // min(time_chunk, T))
    tc = -(-T // num_chunks)
    T_pad = tc * num_chunks
    needs_mask = T_pad != T
    if needs_mask:
        gx = jnp.pad(gx, ((0, T_pad - T), (0, 0), (0, 0)))

    # v7x megacore: split independent batch rows across the two TensorCores
    # when the halves stay sublane-aligned; harmless no-op on v5e/v6e.
    nb = 2 if (B % 2 == 0 and (B // 2) % 8 == 0) else 1
    Bb = B // nb

    # Two interleaved half-batch streams inside the chunk loop (MXU/VPU/EUP
    # overlap) when the per-core block is big enough for aligned halves.
    n_streams = 2 if (Bb % 16 == 0) else 1

    kernel = functools.partial(
        _lstm_recurrent_kernel, seq_len=T, needs_mask=needs_mask,
        n_streams=n_streams)

    # VMEM budget: double-buffered gx/y chunks, (worst-case double-buffered)
    # resident bf16 W_hh, resident h_n/c_n blocks, f32 carries.
    est = (2 * tc * Bb * 4 * H * gx.dtype.itemsize            # gx blocks
           + 2 * tc * Bb * H * jnp.dtype(out_dtype).itemsize    # y blocks
           + 2 * H * 4 * H * w_hh_t.dtype.itemsize              # W_hh
           + 2 * 2 * Bb * H * jnp.dtype(state_dtype).itemsize   # h_n/c_n
           + 2 * Bb * H * 4)                                    # carries
    phys = _physical_vmem_bytes()
    cap = (phys * 3) // 4          # headroom for compiler/internal scratch
    vmem_limit = max(min(int(1.5 * est) + (1 << 20), cap), min(32 << 20, cap))

    grid_spec = pltpu.PrefetchScalarGridSpec(
        num_scalar_prefetch=0,
        grid=(nb, num_chunks),
        in_specs=[
            pl.BlockSpec((tc, Bb, 4 * H), lambda b, t: (t, b, 0)),   # gx chunk
            # TODO(synk): pipeline_mode=pl.Buffered(1) to single-buffer the
            #             constant-index W_hh; bf16 already halves it.
            pl.BlockSpec((H, 4 * H), lambda b, t: (0, 0)),           # W_hh
        ],
        out_specs=[
            pl.BlockSpec((tc, Bb, H), lambda b, t: (t, b, 0)),       # y chunk
            pl.BlockSpec((Bb, H), lambda b, t: (b, 0)),              # h_n
            pl.BlockSpec((Bb, H), lambda b, t: (b, 0)),              # c_n
        ],
        scratch_shapes=[
            pltpu.VMEM((Bb, H), jnp.float32),                        # h carry
            pltpu.VMEM((Bb, H), jnp.float32),                        # c carry
        ],
    )

    y, h_n, c_n = pl.pallas_call(
        kernel,
        out_shape=(
            jax.ShapeDtypeStruct((T_pad, B, H), out_dtype),
            jax.ShapeDtypeStruct((B, H), state_dtype),
            jax.ShapeDtypeStruct((B, H), state_dtype),
        ),
        grid_spec=grid_spec,
        compiler_params=pltpu.CompilerParams(
            dimension_semantics=("parallel", "arbitrary"),  # time is sequential
            vmem_limit_bytes=int(vmem_limit),
        ),
    )(gx, w_hh_t)
    if needs_mask:
        y = y[:T]
    return y, h_n, c_n


def _input_projection(x_tm, w_ih, b_ih, b_hh):
    """x @ W_ih^T + (b_ih + b_hh) for all T steps as one bf16 MXU GEMM.

    bf16 operands / f32 accumulation (no fp32 multi-pass emulation); the result
    is materialized in bf16 to halve its HBM round-trip into the kernel.
    """
    gx = jnp.einsum(
        "tbi,gi->tbg",
        x_tm.astype(jnp.bfloat16), w_ih.astype(jnp.bfloat16),
        preferred_element_type=jnp.float32,
    )
    gx = gx + (b_ih + b_hh).astype(jnp.float32)
    return gx.astype(jnp.bfloat16)


def init_lstm_weightdrop_params(key, input_size, hidden_size, num_layers):
    """Deterministic init mirroring torch.nn.LSTM: U(-1/sqrt(H), 1/sqrt(H))."""
    params = []
    k = 1.0 / jnp.sqrt(jnp.float32(hidden_size))
    in_sz = input_size
    for _ in range(num_layers):
        key, k1, k2, k3, k4 = jax.random.split(key, 5)
        w_ih = jax.random.uniform(k1, (4 * hidden_size, in_sz), jnp.float32, -k, k)
        w_hh = jax.random.uniform(k2, (4 * hidden_size, hidden_size), jnp.float32, -k, k)
        b_ih = jax.random.uniform(k3, (4 * hidden_size,), jnp.float32, -k, k)
        b_hh = jax.random.uniform(k4, (4 * hidden_size,), jnp.float32, -k, k)
        params.append((w_ih, w_hh, b_ih, b_hh))
        in_sz = hidden_size  # unidirectional: next layer input = H
    return params


@jax.jit
def lstm_weight_drop_forward(inputs, params, hidden_state=None):
    """LstmWeightDrop.forward (eval mode).

    inputs : (B, T, input_size) (batch_first)
    params : sequence of (w_ih (4H, I_l), w_hh (4H, H), b_ih (4H,), b_hh (4H,))
    The `hidden_state` argument is ignored, exactly as in the reference module
    (each inner LSTM is called with zero initial state).
    Returns (outputs (B, T, H), (h_n (L, B, H), c_n (L, B, H))).
    """
    del hidden_state
    out_dtype = inputs.dtype
    # One transpose in; activations stay time-major across all layers.
    x = jnp.transpose(inputs, (1, 0, 2))          # (T, B, I)
    h_list, c_list = [], []
    num_layers = len(params)
    for li, (w_ih, w_hh, b_ih, b_hh) in enumerate(params):
        # WeightDrop with variational_dropout=0.0 / eval mode -> identity.
        gx = _input_projection(x, w_ih, b_ih, b_hh)
        w_hh_t = jnp.transpose(w_hh, (1, 0)).astype(jnp.bfloat16)
        # Intermediate activations stay bf16 (re-cast to bf16 for the next
        # layer's input GEMM anyway); final layer restores the input dtype.
        y_dtype = out_dtype if li == num_layers - 1 else jnp.bfloat16
        x, h_n, c_n = lstm_recurrence_pallas(
            gx, w_hh_t, out_dtype=y_dtype, state_dtype=out_dtype)
        h_list.append(h_n)
        c_list.append(c_n)
    outputs = jnp.transpose(x, (1, 0, 2))         # one transpose out
    h_n = jnp.stack(h_list, axis=0)               # == torch.cat over layers
    c_n = jnp.stack(c_list, axis=0)
    return outputs, (h_n, c_n)


if __name__ == "__main__":
    B, T = 2, 8
    INPUT_SIZE, HIDDEN_SIZE, NUM_LAYERS = 16, 32, 2

    key = jax.random.PRNGKey(0)
    key, k_in = jax.random.split(key)
    x = jax.random.normal(k_in, (B, T, INPUT_SIZE), jnp.float32)

    params = init_lstm_weightdrop_params(key, INPUT_SIZE, HIDDEN_SIZE, NUM_LAYERS)

    outputs, (h_n, c_n) = lstm_weight_drop_forward(x, params)
    jax.block_until_ready((outputs, h_n, c_n))

    assert outputs.shape == (B, T, HIDDEN_SIZE)
    assert outputs.dtype == x.dtype
    assert h_n.shape == (NUM_LAYERS, B, HIDDEN_SIZE)
    assert c_n.shape == (NUM_LAYERS, B, HIDDEN_SIZE)

    # Matched-precision pure-JAX reference: same bf16-operand / f32-accumulate
    # policy as the kernel path (per review: precision consistent on both
    # paths), so the tolerance checks kernel correctness, not MXU modes.
    def ref_layer(x_tm, w_ih, w_hh, b_ih, b_hh):
        Hh = w_hh.shape[1]
        Bh = x_tm.shape[1]
        gx = _input_projection(x_tm, w_ih, b_ih, b_hh).astype(jnp.float32)
        w_hh_t = jnp.transpose(w_hh, (1, 0)).astype(jnp.bfloat16)

        def step(carry, gx_t):
            h, c = carry
            z = gx_t + jnp.dot(h.astype(jnp.bfloat16), w_hh_t,
                               preferred_element_type=jnp.float32)
            i = jax.nn.sigmoid(z[:, :Hh])
            f = jax.nn.sigmoid(z[:, Hh:2 * Hh])
            g = jnp.tanh(z[:, 2 * Hh:3 * Hh])
            o = jax.nn.sigmoid(z[:, 3 * Hh:])
            c = f * c + i * g
            h = o * jnp.tanh(c)
            return (h, c), h

        (hT, cT), ys = jax.lax.scan(
            step,
            (jnp.zeros((Bh, Hh), jnp.float32), jnp.zeros((Bh, Hh), jnp.float32)),
            gx)
        return ys, hT, cT

    x_tm = jnp.transpose(x, (1, 0, 2))
    ref_h, ref_c = [], []
    for (w_ih, w_hh, b_ih, b_hh) in params:
        x_tm, hT, cT = ref_layer(x_tm, w_ih, w_hh, b_ih, b_hh)
        ref_h.append(hT)
        ref_c.append(cT)
    ref_out = jnp.transpose(x_tm, (1, 0, 2))

    assert jnp.allclose(outputs.astype(jnp.float32), ref_out, atol=2e-2, rtol=2e-2)
    assert jnp.allclose(h_n.astype(jnp.float32), jnp.stack(ref_h), atol=2e-2, rtol=2e-2)
    assert jnp.allclose(c_n.astype(jnp.float32), jnp.stack(ref_c), atol=2e-2, rtol=2e-2)

    print("KERNEL_OK")
</pallas_src>

<mosaic_0001>
module attributes {stable_mosaic.version = 11 : i64} {
  func.func @_lstm_recurrent_kernel(%arg0: i32, %arg1: i32, %arg2: memref<8x2x128xbf16, #tpu.memory_space<vmem>>, %arg3: memref<32x128xbf16, #tpu.memory_space<vmem>>, %arg4: memref<8x2x32xf32, #tpu.memory_space<vmem>>, %arg5: memref<2x32xf32, #tpu.memory_space<vmem>>, %arg6: memref<2x32xf32, #tpu.memory_space<vmem>>, %arg7: memref<2x32xf32, #tpu.memory_space<vmem>>, %arg8: memref<2x32xf32, #tpu.memory_space<vmem>>) attributes {dimension_semantics = [#tpu.dimension_semantics<parallel>, #tpu.dimension_semantics<arbitrary>], iteration_bounds = array<i64: 1, 1>, scalar_prefetch = 0 : i64, scratch_operands = 2 : i64, tpu.core_type = #tpu.core_type<tc>, window_params = [{transform_indices = @transform_0, window_bounds = array<i64: 8, 2, 128>}, {pipeline_mode = #tpu.pipeline_mode<synchronous>, transform_indices = @transform_1, window_bounds = array<i64: 32, 128>}, {transform_indices = @transform_2, window_bounds = array<i64: 8, 2, 32>}, {transform_indices = @transform_3, window_bounds = array<i64: 2, 32>}, {transform_indices = @transform_4, window_bounds = array<i64: 2, 32>}]} {
    %c0_i32 = arith.constant 0 : i32
    %0 = arith.cmpi eq, %arg1, %c0_i32 : i32
    %1 = arith.extui %0 : i1 to i32
    %c0_i32_0 = arith.constant 0 : i32
    %2 = arith.cmpi ne, %1, %c0_i32_0 : i32
    scf.if %2 {
      %cst_76 = arith.constant 0.000000e+00 : f32
      %299 = vector.broadcast %cst_76 : f32 to vector<2x32xf32>
      %c0_77 = arith.constant 0 : index
      %c0_78 = arith.constant 0 : index
      %300 = vector.load %arg7[%c0_77, %c0_78] : memref<2x32xf32, #tpu.memory_space<vmem>>, vector<2x32xf32>
      tpu.vector_store %arg7[%c0_77, %c0_78], %299 {strides = array<i32>} : memref<2x32xf32, #tpu.memory_space<vmem>>, vector<2x32xf32>,
      %cst_79 = arith.constant 0.000000e+00 : f32
      %301 = vector.broadcast %cst_79 : f32 to vector<2x32xf32>
      %c0_80 = arith.constant 0 : index
      %c0_81 = arith.constant 0 : index
      %302 = vector.load %arg8[%c0_80, %c0_81] : memref<2x32xf32, #tpu.memory_space<vmem>>, vector<2x32xf32>
      tpu.vector_store %arg8[%c0_80, %c0_81], %301 {strides = array<i32>} : memref<2x32xf32, #tpu.memory_space<vmem>>, vector<2x32xf32>,
    } else {
    }
    %c0 = arith.constant 0 : index
    %c0_1 = arith.constant 0 : index
    %3 = vector.load %arg3[%c0, %c0_1] : memref<32x128xbf16, #tpu.memory_space<vmem>>, vector<32x128xbf16>
    %c0_2 = arith.constant 0 : index
    %c0_3 = arith.constant 0 : index
    %4 = vector.load %arg7[%c0_2, %c0_3] : memref<2x32xf32, #tpu.memory_space<vmem>>, vector<2x32xf32>
    %c0_4 = arith.constant 0 : index
    %c0_5 = arith.constant 0 : index
    %5 = vector.load %arg8[%c0_4, %c0_5] : memref<2x32xf32, #tpu.memory_space<vmem>>, vector<2x32xf32>
    %c0_i32_6 = arith.constant 0 : i32
    %6 = arith.index_cast %c0_i32_6 : i32 to index
    %c0_7 = arith.constant 0 : index
    %c0_8 = arith.constant 0 : index
    %7 = vector.load %arg2[%6, %c0_7, %c0_8] : memref<8x2x128xbf16, #tpu.memory_space<vmem>>, vector<1x2x128xbf16>
    %8 = vector.shape_cast %7 : vector<1x2x128xbf16> to vector<2x128xbf16>
    %9 = arith.extf %8 : vector<2x128xbf16> to vector<2x128xf32>
    %10 = arith.truncf %4 : vector<2x32xf32> to vector<2x32xbf16>
    %cst = arith.constant dense<0.000000e+00> : vector<2x128xf32>
    %11 = tpu.matmul %10, %3, %cst {dimension_numbers = #tpu.dot_dimension_numbers<[1], [0], [0], [1], [0, 0, 1, 1], [], []>} : vector<2x32xbf16>, vector<32x128xbf16>, vector<2x128xf32> -> vector<2x128xf32>
    %12 = arith.addf %9, %11 : vector<2x128xf32>
    %13 = vector.extract_strided_slice %12 {offsets = [0, 0], sizes = [2, 32], strides = [1, 1]} : vector<2x128xf32> to vector<2x32xf32>
    %14 = arith.negf %13 : vector<2x32xf32>
    %15 = math.exp %14 : vector<2x32xf32>
    %cst_9 = arith.constant 1.000000e+00 : f32
    %16 = vector.broadcast %cst_9 : f32 to vector<2x32xf32>
    %17 = arith.addf %16, %15 : vector<2x32xf32>
    %18 = arith.divf %16, %17 : vector<2x32xf32>
    %19 = vector.extract_strided_slice %12 {offsets = [0, 32], sizes = [2, 32], strides = [1, 1]} : vector<2x128xf32> to vector<2x32xf32>
    %20 = arith.negf %19 : vector<2x32xf32>
    %21 = math.exp %20 : vector<2x32xf32>
    %cst_10 = arith.constant 1.000000e+00 : f32
    %22 = vector.broadcast %cst_10 : f32 to vector<2x32xf32>
    %23 = arith.addf %22, %21 : vector<2x32xf32>
    %24 = arith.divf %22, %23 : vector<2x32xf32>
    %25 = vector.extract_strided_slice %12 {offsets = [0, 64], sizes = [2, 32], strides = [1, 1]} : vector<2x128xf32> to vector<2x32xf32>
    %26 = math.tanh %25 : vector<2x32xf32>
    %27 = vector.extract_strided_slice %12 {offsets = [0, 96], sizes = [2, 32], strides = [1, 1]} : vector<2x128xf32> to vector<2x32xf32>
    %28 = arith.negf %27 : vector<2x32xf32>
    %29 = math.exp %28 : vector<2x32xf32>
    %cst_11 = arith.constant 1.000000e+00 : f32
    %30 = vector.broadcast %cst_11 : f32 to vector<2x32xf32>
    %31 = arith.addf %30, %29 : vector<2x32xf32>
    %32 = arith.divf %30, %31 : vector<2x32xf32>
    %33 = arith.mulf %24, %5 : vector<2x32xf32>
    %34 = arith.mulf %18, %26 : vector<2x32xf32>
    %35 = arith.addf %33, %34 : vector<2x32xf32>
    %36 = math.tanh %35 : vector<2x32xf32>
    %37 = arith.mulf %32, %36 : vector<2x32xf32>
    %38 = arith.index_cast %c0_i32_6 : i32 to index
    %c0_12 = arith.constant 0 : index
    %c0_13 = arith.constant 0 : index
    %39 = vector.load %arg4[%38, %c0_12, %c0_13] : memref<8x2x32xf32, #tpu.memory_space<vmem>>, vector<1x2x32xf32>
    %40 = vector.shape_cast %39 : vector<1x2x32xf32> to vector<2x32xf32>
    %41 = vector.shape_cast %37 : vector<2x32xf32> to vector<1x2x32xf32>
    tpu.vector_store %arg4[%38, %c0_12, %c0_13], %41 {strides = array<i32>} : memref<8x2x32xf32, #tpu.memory_space<vmem>>, vector<1x2x32xf32>,
    %c1_i32 = arith.constant 1 : i32
    %42 = arith.index_cast %c1_i32 : i32 to index
    %c0_14 = arith.constant 0 : index
    %c0_15 = arith.constant 0 : index
    %43 = vector.load %arg2[%42, %c0_14, %c0_15] : memref<8x2x128xbf16, #tpu.memory_space<vmem>>, vector<1x2x128xbf16>
    %44 = vector.shape_cast %43 : vector<1x2x128xbf16> to vector<2x128xbf16>
    %45 = arith.extf %44 : vector<2x128xbf16> to vector<2x128xf32>
    %46 = arith.truncf %37 : vector<2x32xf32> to vector<2x32xbf16>
    %cst_16 = arith.constant dense<0.000000e+00> : vector<2x128xf32>
    %47 = tpu.matmul %46, %3, %cst_16 {dimension_numbers = #tpu.dot_dimension_numbers<[1], [0], [0], [1], [0, 0, 1, 1], [], []>} : vector<2x32xbf16>, vector<32x128xbf16>, vector<2x128xf32> -> vector<2x128xf32>
    %48 = arith.addf %45, %47 : vector<2x128xf32>
    %49 = vector.extract_strided_slice %48 {offsets = [0, 0], sizes = [2, 32], strides = [1, 1]} : vector<2x128xf32> to vector<2x32xf32>
    %50 = arith.negf %49 : vector<2x32xf32>
    %51 = math.exp %50 : vector<2x32xf32>
    %cst_17 = arith.constant 1.000000e+00 : f32
    %52 = vector.broadcast %cst_17 : f32 to vector<2x32xf32>
    %53 = arith.addf %52, %51 : vector<2x32xf32>
    %54 = arith.divf %52, %53 : vector<2x32xf32>
    %55 = vector.extract_strided_slice %48 {offsets = [0, 32], sizes = [2, 32], strides = [1, 1]} : vector<2x128xf32> to vector<2x32xf32>
    %56 = arith.negf %55 : vector<2x32xf32>
    %57 = math.exp %56 : vector<2x32xf32>
    %cst_18 = arith.constant 1.000000e+00 : f32
    %58 = vector.broadcast %cst_18 : f32 to vector<2x32xf32>
    %59 = arith.addf %58, %57 : vector<2x32xf32>
    %60 = arith.divf %58, %59 : vector<2x32xf32>
    %61 = vector.extract_strided_slice %48 {offsets = [0, 64], sizes = [2, 32], strides = [1, 1]} : vector<2x128xf32> to vector<2x32xf32>
    %62 = math.tanh %61 : vector<2x32xf32>
    %63 = vector.extract_strided_slice %48 {offsets = [0, 96], sizes = [2, 32], strides = [1, 1]} : vector<2x128xf32> to vector<2x32xf32>
    %64 = arith.negf %63 : vector<2x32xf32>
    %65 = math.exp %64 : vector<2x32xf32>
    %cst_19 = arith.constant 1.000000e+00 : f32
    %66 = vector.broadcast %cst_19 : f32 to vector<2x32xf32>
    %67 = arith.addf %66, %65 : vector<2x32xf32>
    %68 = arith.divf %66, %67 : vector<2x32xf32>
    %69 = arith.mulf %60, %35 : vector<2x32xf32>
    %70 = arith.mulf %54, %62 : vector<2x32xf32>
    %71 = arith.addf %69, %70 : vector<2x32xf32>
    %72 = math.tanh %71 : vector<2x32xf32>
    %73 = arith.mulf %68, %72 : vector<2x32xf32>
    %74 = arith.index_cast %c1_i32 : i32 to index
    %c0_20 = arith.constant 0 : index
    %c0_21 = arith.constant 0 : index
    %75 = vector.load %arg4[%74, %c0_20, %c0_21] : memref<8x2x32xf32, #tpu.memory_space<vmem>>, vector<1x2x32xf32>
    %76 = vector.shape_cast %75 : vector<1x2x32xf32> to vector<2x32xf32>
    %77 = vector.shape_cast %73 : vector<2x32xf32> to vector<1x2x32xf32>
    tpu.vector_store %arg4[%74, %c0_20, %c0_21], %77 {strides = array<i32>} : memref<8x2x32xf32, #tpu.memory_space<vmem>>, vector<1x2x32xf32>,
    %c2_i32 = arith.constant 2 : i32
    %78 = arith.index_cast %c2_i32 : i32 to index
    %c0_22 = arith.constant 0 : index
    %c0_23 = arith.constant 0 : index
    %79 = vector.load %arg2[%78, %c0_22, %c0_23] : memref<8x2x128xbf16, #tpu.memory_space<vmem>>, vector<1x2x128xbf16>
    %80 = vector.shape_cast %79 : vector<1x2x128xbf16> to vector<2x128xbf16>
    %81 = arith.extf %80 : vector<2x128xbf16> to vector<2x128xf32>
    %82 = arith.truncf %73 : vector<2x32xf32> to vector<2x32xbf16>
    %cst_24 = arith.constant dense<0.000000e+00> : vector<2x128xf32>
    %83 = tpu.matmul %82, %3, %cst_24 {dimension_numbers = #tpu.dot_dimension_numbers<[1], [0], [0], [1], [0, 0, 1, 1], [], []>} : vector<2x32xbf16>, vector<32x128xbf16>, vector<2x128xf32> -> vector<2x128xf32>
    %84 = arith.addf %81, %83 : vector<2x128xf32>
    %85 = vector.extract_strided_slice %84 {offsets = [0, 0], sizes = [2, 32], strides = [1, 1]} : vector<2x128xf32> to vector<2x32xf32>
    %86 = arith.negf %85 : vector<2x32xf32>
    %87 = math.exp %86 : vector<2x32xf32>
    %cst_25 = arith.constant 1.000000e+00 : f32
    %88 = vector.broadcast %cst_25 : f32 to vector<2x32xf32>
    %89 = arith.addf %88, %87 : vector<2x32xf32>
    %90 = arith.divf %88, %89 : vector<2x32xf32>
    %91 = vector.extract_strided_slice %84 {offsets = [0, 32], sizes = [2, 32], strides = [1, 1]} : vector<2x128xf32> to vector<2x32xf32>
    %92 = arith.negf %91 : vector<2x32xf32>
    %93 = math.exp %92 : vector<2x32xf32>
    %cst_26 = arith.constant 1.000000e+00 : f32
    %94 = vector.broadcast %cst_26 : f32 to vector<2x32xf32>
    %95 = arith.addf %94, %93 : vector<2x32xf32>
    %96 = arith.divf %94, %95 : vector<2x32xf32>
    %97 = vector.extract_strided_slice %84 {offsets = [0, 64], sizes = [2, 32], strides = [1, 1]} : vector<2x128xf32> to vector<2x32xf32>
    %98 = math.tanh %97 : vector<2x32xf32>
    %99 = vector.extract_strided_slice %84 {offsets = [0, 96], sizes = [2, 32], strides = [1, 1]} : vector<2x128xf32> to vector<2x32xf32>
    %100 = arith.negf %99 : vector<2x32xf32>
    %101 = math.exp %100 : vector<2x32xf32>
    %cst_27 = arith.constant 1.000000e+00 : f32
    %102 = vector.broadcast %cst_27 : f32 to vector<2x32xf32>
    %103 = arith.addf %102, %101 : vector<2x32xf32>
    %104 = arith.divf %102, %103 : vector<2x32xf32>
    %105 = arith.mulf %96, %71 : vector<2x32xf32>
    %106 = arith.mulf %90, %98 : vector<2x32xf32>
    %107 = arith.addf %105, %106 : vector<2x32xf32>
    %108 = math.tanh %107 : vector<2x32xf32>
    %109 = arith.mulf %104, %108 : vector<2x32xf32>
    %110 = arith.index_cast %c2_i32 : i32 to index
    %c0_28 = arith.constant 0 : index
    %c0_29 = arith.constant 0 : index
    %111 = vector.load %arg4[%110, %c0_28, %c0_29] : memref<8x2x32xf32, #tpu.memory_space<vmem>>, vector<1x2x32xf32>
    %112 = vector.shape_cast %111 : vector<1x2x32xf32> to vector<2x32xf32>
    %113 = vector.shape_cast %109 : vector<2x32xf32> to vector<1x2x32xf32>
    tpu.vector_store %arg4[%110, %c0_28, %c0_29], %113 {strides = array<i32>} : memref<8x2x32xf32, #tpu.memory_space<vmem>>, vector<1x2x32xf32>,
    %c3_i32 = arith.constant 3 : i32
    %114 = arith.index_cast %c3_i32 : i32 to index
    %c0_30 = arith.constant 0 : index
    %c0_31 = arith.constant 0 : index
    %115 = vector.load %arg2[%114, %c0_30, %c0_31] : memref<8x2x128xbf16, #tpu.memory_space<vmem>>, vector<1x2x128xbf16>
    %116 = vector.shape_cast %115 : vector<1x2x128xbf16> to vector<2x128xbf16>
    %117 = arith.extf %116 : vector<2x128xbf16> to vector<2x128xf32>
    %118 = arith.truncf %109 : vector<2x32xf32> to vector<2x32xbf16>
    %cst_32 = arith.constant dense<0.000000e+00> : vector<2x128xf32>
    %119 = tpu.matmul %118, %3, %cst_32 {dimension_numbers = #tpu.dot_dimension_numbers<[1], [0], [0], [1], [0, 0, 1, 1], [], []>} : vector<2x32xbf16>, vector<32x128xbf16>, vector<2x128xf32> -> vector<2x128xf32>
    %120 = arith.addf %117, %119 : vector<2x128xf32>
    %121 = vector.extract_strided_slice %120 {offsets = [0, 0], sizes = [2, 32], strides = [1, 1]} : vector<2x128xf32> to vector<2x32xf32>
    %122 = arith.negf %121 : vector<2x32xf32>
    %123 = math.exp %122 : vector<2x32xf32>
    %cst_33 = arith.constant 1.000000e+00 : f32
    %124 = vector.broadcast %cst_33 : f32 to vector<2x32xf32>
    %125 = arith.addf %124, %123 : vector<2x32xf32>
    %126 = arith.divf %124, %125 : vector<2x32xf32>
    %127 = vector.extract_strided_slice %120 {offsets = [0, 32], sizes = [2, 32], strides = [1, 1]} : vector<2x128xf32> to vector<2x32xf32>
    %128 = arith.negf %127 : vector<2x32xf32>
    %129 = math.exp %128 : vector<2x32xf32>
    %cst_34 = arith.constant 1.000000e+00 : f32
    %130 = vector.broadcast %cst_34 : f32 to vector<2x32xf32>
    %131 = arith.addf %130, %129 : vector<2x32xf32>
    %132 = arith.divf %130, %131 : vector<2x32xf32>
    %133 = vector.extract_strided_slice %120 {offsets = [0, 64], sizes = [2, 32], strides = [1, 1]} : vector<2x128xf32> to vector<2x32xf32>
    %134 = math.tanh %133 : vector<2x32xf32>
    %135 = vector.extract_strided_slice %120 {offsets = [0, 96], sizes = [2, 32], strides = [1, 1]} : vector<2x128xf32> to vector<2x32xf32>
    %136 = arith.negf %135 : vector<2x32xf32>
    %137 = math.exp %136 : vector<2x32xf32>
    %cst_35 = arith.constant 1.000000e+00 : f32
    %138 = vector.broadcast %cst_35 : f32 to vector<2x32xf32>
    %139 = arith.addf %138, %137 : vector<2x32xf32>
    %140 = arith.divf %138, %139 : vector<2x32xf32>
    %141 = arith.mulf %132, %107 : vector<2x32xf32>
    %142 = arith.mulf %126, %134 : vector<2x32xf32>
    %143 = arith.addf %141, %142 : vector<2x32xf32>
    %144 = math.tanh %143 : vector<2x32xf32>
    %145 = arith.mulf %140, %144 : vector<2x32xf32>
    %146 = arith.index_cast %c3_i32 : i32 to index
    %c0_36 = arith.constant 0 : index
    %c0_37 = arith.constant 0 : index
    %147 = vector.load %arg4[%146, %c0_36, %c0_37] : memref<8x2x32xf32, #tpu.memory_space<vmem>>, vector<1x2x32xf32>
    %148 = vector.shape_cast %147 : vector<1x2x32xf32> to vector<2x32xf32>
    %149 = vector.shape_cast %145 : vector<2x32xf32> to vector<1x2x32xf32>
    tpu.vector_store %arg4[%146, %c0_36, %c0_37], %149 {strides = array<i32>} : memref<8x2x32xf32, #tpu.memory_space<vmem>>, vector<1x2x32xf32>,
    %c4_i32 = arith.constant 4 : i32
    %150 = arith.index_cast %c4_i32 : i32 to index
    %c0_38 = arith.constant 0 : index
    %c0_39 = arith.constant 0 : index
    %151 = vector.load %arg2[%150, %c0_38, %c0_39] : memref<8x2x128xbf16, #tpu.memory_space<vmem>>, vector<1x2x128xbf16>
    %152 = vector.shape_cast %151 : vector<1x2x128xbf16> to vector<2x128xbf16>
    %153 = arith.extf %152 : vector<2x128xbf16> to vector<2x128xf32>
    %154 = arith.truncf %145 : vector<2x32xf32> to vector<2x32xbf16>
    %cst_40 = arith.constant dense<0.000000e+00> : vector<2x128xf32>
    %155 = tpu.matmul %154, %3, %cst_40 {dimension_numbers = #tpu.dot_dimension_numbers<[1], [0], [0], [1], [0, 0, 1, 1], [], []>} : vector<2x32xbf16>, vector<32x128xbf16>, vector<2x128xf32> -> vector<2x128xf32>
    %156 = arith.addf %153, %155 : vector<2x128xf32>
    %157 = vector.extract_strided_slice %156 {offsets = [0, 0], sizes = [2, 32], strides = [1, 1]} : vector<2x128xf32> to vector<2x32xf32>
    %158 = arith.negf %157 : vector<2x32xf32>
    %159 = math.exp %158 : vector<2x32xf32>
    %cst_41 = arith.constant 1.000000e+00 : f32
    %160 = vector.broadcast %cst_41 : f32 to vector<2x32xf32>
    %161 = arith.addf %160, %159 : vector<2x32xf32>
    %162 = arith.divf %160, %161 : vector<2x32xf32>
    %163 = vector.extract_strided_slice %156 {offsets = [0, 32], sizes = [2, 32], strides = [1, 1]} : vector<2x128xf32> to vector<2x32xf32>
    %164 = arith.negf %163 : vector<2x32xf32>
    %165 = math.exp %164 : vector<2x32xf32>
    %cst_42 = arith.constant 1.000000e+00 : f32
    %166 = vector.broadcast %cst_42 : f32 to vector<2x32xf32>
    %167 = arith.addf %166, %165 : vector<2x32xf32>
    %168 = arith.divf %166, %167 : vector<2x32xf32>
    %169 = vector.extract_strided_slice %156 {offsets = [0, 64], sizes = [2, 32], strides = [1, 1]} : vector<2x128xf32> to vector<2x32xf32>
    %170 = math.tanh %169 : vector<2x32xf32>
    %171 = vector.extract_strided_slice %156 {offsets = [0, 96], sizes = [2, 32], strides = [1, 1]} : vector<2x128xf32> to vector<2x32xf32>
    %172 = arith.negf %171 : vector<2x32xf32>
    %173 = math.exp %172 : vector<2x32xf32>
    %cst_43 = arith.constant 1.000000e+00 : f32
    %174 = vector.broadcast %cst_43 : f32 to vector<2x32xf32>
    %175 = arith.addf %174, %173 : vector<2x32xf32>
    %176 = arith.divf %174, %175 : vector<2x32xf32>
    %177 = arith.mulf %168, %143 : vector<2x32xf32>
    %178 = arith.mulf %162, %170 : vector<2x32xf32>
    %179 = arith.addf %177, %178 : vector<2x32xf32>
    %180 = math.tanh %179 : vector<2x32xf32>
    %181 = arith.mulf %176, %180 : vector<2x32xf32>
    %182 = arith.index_cast %c4_i32 : i32 to index
    %c0_44 = arith.constant 0 : index
    %c0_45 = arith.constant 0 : index
    %183 = vector.load %arg4[%182, %c0_44, %c0_45] : memref<8x2x32xf32, #tpu.memory_space<vmem>>, vector<1x2x32xf32>
    %184 = vector.shape_cast %183 : vector<1x2x32xf32> to vector<2x32xf32>
    %185 = vector.shape_cast %181 : vector<2x32xf32> to vector<1x2x32xf32>
    tpu.vector_store %arg4[%182, %c0_44, %c0_45], %185 {strides = array<i32>} : memref<8x2x32xf32, #tpu.memory_space<vmem>>, vector<1x2x32xf32>,
    %c5_i32 = arith.constant 5 : i32
    %186 = arith.index_cast %c5_i32 : i32 to index
    %c0_46 = arith.constant 0 : index
    %c0_47 = arith.constant 0 : index
    %187 = vector.load %arg2[%186, %c0_46, %c0_47] : memref<8x2x128xbf16, #tpu.memory_space<vmem>>, vector<1x2x128xbf16>
    %188 = vector.shape_cast %187 : vector<1x2x128xbf16> to vector<2x128xbf16>
    %189 = arith.extf %188 : vector<2x128xbf16> to vector<2x128xf32>
    %190 = arith.truncf %181 : vector<2x32xf32> to vector<2x32xbf16>
    %cst_48 = arith.constant dense<0.000000e+00> : vector<2x128xf32>
    %191 = tpu.matmul %190, %3, %cst_48 {dimension_numbers = #tpu.dot_dimension_numbers<[1], [0], [0], [1], [0, 0, 1, 1], [], []>} : vector<2x32xbf16>, vector<32x128xbf16>, vector<2x128xf32> -> vector<2x128xf32>
    %192 = arith.addf %189, %191 : vector<2x128xf32>
    %193 = vector.extract_strided_slice %192 {offsets = [0, 0], sizes = [2, 32], strides = [1, 1]} : vector<2x128xf32> to vector<2x32xf32>
    %194 = arith.negf %193 : vector<2x32xf32>
    %195 = math.exp %194 : vector<2x32xf32>
    %cst_49 = arith.constant 1.000000e+00 : f32
    %196 = vector.broadcast %cst_49 : f32 to vector<2x32xf32>
    %197 = arith.addf %196, %195 : vector<2x32xf32>
    %198 = arith.divf %196, %197 : vector<2x32xf32>
    %199 = vector.extract_strided_slice %192 {offsets = [0, 32], sizes = [2, 32], strides = [1, 1]} : vector<2x128xf32> to vector<2x32xf32>
    %200 = arith.negf %199 : vector<2x32xf32>
    %201 = math.exp %200 : vector<2x32xf32>
    %cst_50 = arith.constant 1.000000e+00 : f32
    %202 = vector.broadcast %cst_50 : f32 to vector<2x32xf32>
    %203 = arith.addf %202, %201 : vector<2x32xf32>
    %204 = arith.divf %202, %203 : vector<2x32xf32>
    %205 = vector.extract_strided_slice %192 {offsets = [0, 64], sizes = [2, 32], strides = [1, 1]} : vector<2x128xf32> to vector<2x32xf32>
    %206 = math.tanh %205 : vector<2x32xf32>
    %207 = vector.extract_strided_slice %192 {offsets = [0, 96], sizes = [2, 32], strides = [1, 1]} : vector<2x128xf32> to vector<2x32xf32>
    %208 = arith.negf %207 : vector<2x32xf32>
    %209 = math.exp %208 : vector<2x32xf32>
    %cst_51 = arith.constant 1.000000e+00 : f32
    %210 = vector.broadcast %cst_51 : f32 to vector<2x32xf32>
    %211 = arith.addf %210, %209 : vector<2x32xf32>
    %212 = arith.divf %210, %211 : vector<2x32xf32>
    %213 = arith.mulf %204, %179 : vector<2x32xf32>
    %214 = arith.mulf %198, %206 : vector<2x32xf32>
    %215 = arith.addf %213, %214 : vector<2x32xf32>
    %216 = math.tanh %215 : vector<2x32xf32>
    %217 = arith.mulf %212, %216 : vector<2x32xf32>
    %218 = arith.index_cast %c5_i32 : i32 to index
    %c0_52 = arith.constant 0 : index
    %c0_53 = arith.constant 0 : index
    %219 = vector.load %arg4[%218, %c0_52, %c0_53] : memref<8x2x32xf32, #tpu.memory_space<vmem>>, vector<1x2x32xf32>
    %220 = vector.shape_cast %219 : vector<1x2x32xf32> to vector<2x32xf32>
    %221 = vector.shape_cast %217 : vector<2x32xf32> to vector<1x2x32xf32>
    tpu.vector_store %arg4[%218, %c0_52, %c0_53], %221 {strides = array<i32>} : memref<8x2x32xf32, #tpu.memory_space<vmem>>, vector<1x2x32xf32>,
    %c6_i32 = arith.constant 6 : i32
    %222 = arith.index_cast %c6_i32 : i32 to index
    %c0_54 = arith.constant 0 : index
    %c0_55 = arith.constant 0 : index
    %223 = vector.load %arg2[%222, %c0_54, %c0_55] : memref<8x2x128xbf16, #tpu.memory_space<vmem>>, vector<1x2x128xbf16>
    %224 = vector.shape_cast %223 : vector<1x2x128xbf16> to vector<2x128xbf16>
    %225 = arith.extf %224 : vector<2x128xbf16> to vector<2x128xf32>
    %226 = arith.truncf %217 : vector<2x32xf32> to vector<2x32xbf16>
    %cst_56 = arith.constant dense<0.000000e+00> : vector<2x128xf32>
    %227 = tpu.matmul %226, %3, %cst_56 {dimension_numbers = #tpu.dot_dimension_numbers<[1], [0], [0], [1], [0, 0, 1, 1], [], []>} : vector<2x32xbf16>, vector<32x128xbf16>, vector<2x128xf32> -> vector<2x128xf32>
    %228 = arith.addf %225, %227 : vector<2x128xf32>
    %229 = vector.extract_strided_slice %228 {offsets = [0, 0], sizes = [2, 32], strides = [1, 1]} : vector<2x128xf32> to vector<2x32xf32>
    %230 = arith.negf %229 : vector<2x32xf32>
    %231 = math.exp %230 : vector<2x32xf32>
    %cst_57 = arith.constant 1.000000e+00 : f32
    %232 = vector.broadcast %cst_57 : f32 to vector<2x32xf32>
    %233 = arith.addf %232, %231 : vector<2x32xf32>
    %234 = arith.divf %232, %233 : vector<2x32xf32>
    %235 = vector.extract_strided_slice %228 {offsets = [0, 32], sizes = [2, 32], strides = [1, 1]} : vector<2x128xf32> to vector<2x32xf32>
    %236 = arith.negf %235 : vector<2x32xf32>
    %237 = math.exp %236 : vector<2x32xf32>
    %cst_58 = arith.constant 1.000000e+00 : f32
    %238 = vector.broadcast %cst_58 : f32 to vector<2x32xf32>
    %239 = arith.addf %238, %237 : vector<2x32xf32>
    %240 = arith.divf %238, %239 : vector<2x32xf32>
    %241 = vector.extract_strided_slice %228 {offsets = [0, 64], sizes = [2, 32], strides = [1, 1]} : vector<2x128xf32> to vector<2x32xf32>
    %242 = math.tanh %241 : vector<2x32xf32>
    %243 = vector.extract_strided_slice %228 {offsets = [0, 96], sizes = [2, 32], strides = [1, 1]} : vector<2x128xf32> to vector<2x32xf32>
    %244 = arith.negf %243 : vector<2x32xf32>
    %245 = math.exp %244 : vector<2x32xf32>
    %cst_59 = arith.constant 1.000000e+00 : f32
    %246 = vector.broadcast %cst_59 : f32 to vector<2x32xf32>
    %247 = arith.addf %246, %245 : vector<2x32xf32>
    %248 = arith.divf %246, %247 : vector<2x32xf32>
    %249 = arith.mulf %240, %215 : vector<2x32xf32>
    %250 = arith.mulf %234, %242 : vector<2x32xf32>
    %251 = arith.addf %249, %250 : vector<2x32xf32>
    %252 = math.tanh %251 : vector<2x32xf32>
    %253 = arith.mulf %248, %252 : vector<2x32xf32>
    %254 = arith.index_cast %c6_i32 : i32 to index
    %c0_60 = arith.constant 0 : index
    %c0_61 = arith.constant 0 : index
    %255 = vector.load %arg4[%254, %c0_60, %c0_61] : memref<8x2x32xf32, #tpu.memory_space<vmem>>, vector<1x2x32xf32>
    %256 = vector.shape_cast %255 : vector<1x2x32xf32> to vector<2x32xf32>
    %257 = vector.shape_cast %253 : vector<2x32xf32> to vector<1x2x32xf32>
    tpu.vector_store %arg4[%254, %c0_60, %c0_61], %257 {strides = array<i32>} : memref<8x2x32xf32, #tpu.memory_space<vmem>>, vector<1x2x32xf32>,
    %c7_i32 = arith.constant 7 : i32
    %258 = arith.index_cast %c7_i32 : i32 to index
    %c0_62 = arith.constant 0 : index
    %c0_63 = arith.constant 0 : index
    %259 = vector.load %arg2[%258, %c0_62, %c0_63] : memref<8x2x128xbf16, #tpu.memory_space<vmem>>, vector<1x2x128xbf16>
    %260 = vector.shape_cast %259 : vector<1x2x128xbf16> to vector<2x128xbf16>
    %261 = arith.extf %260 : vector<2x128xbf16> to vector<2x128xf32>
    %262 = arith.truncf %253 : vector<2x32xf32> to vector<2x32xbf16>
    %cst_64 = arith.constant dense<0.000000e+00> : vector<2x128xf32>
    %263 = tpu.matmul %262, %3, %cst_64 {dimension_numbers = #tpu.dot_dimension_numbers<[1], [0], [0], [1], [0, 0, 1, 1], [], []>} : vector<2x32xbf16>, vector<32x128xbf16>, vector<2x128xf32> -> vector<2x128xf32>
    %264 = arith.addf %261, %263 : vector<2x128xf32>
    %265 = vector.extract_strided_slice %264 {offsets = [0, 0], sizes = [2, 32], strides = [1, 1]} : vector<2x128xf32> to vector<2x32xf32>
    %266 = arith.negf %265 : vector<2x32xf32>
    %267 = math.exp %266 : vector<2x32xf32>
    %cst_65 = arith.constant 1.000000e+00 : f32
    %268 = vector.broadcast %cst_65 : f32 to vector<2x32xf32>
    %269 = arith.addf %268, %267 : vector<2x32xf32>
    %270 = arith.divf %268, %269 : vector<2x32xf32>
    %271 = vector.extract_strided_slice %264 {offsets = [0, 32], sizes = [2, 32], strides = [1, 1]} : vector<2x128xf32> to vector<2x32xf32>
    %272 = arith.negf %271 : vector<2x32xf32>
    %273 = math.exp %272 : vector<2x32xf32>
    %cst_66 = arith.constant 1.000000e+00 : f32
    %274 = vector.broadcast %cst_66 : f32 to vector<2x32xf32>
    %275 = arith.addf %274, %273 : vector<2x32xf32>
    %276 = arith.divf %274, %275 : vector<2x32xf32>
    %277 = vector.extract_strided_slice %264 {offsets = [0, 64], sizes = [2, 32], strides = [1, 1]} : vector<2x128xf32> to vector<2x32xf32>
    %278 = math.tanh %277 : vector<2x32xf32>
    %279 = vector.extract_strided_slice %264 {offsets = [0, 96], sizes = [2, 32], strides = [1, 1]} : vector<2x128xf32> to vector<2x32xf32>
    %280 = arith.negf %279 : vector<2x32xf32>
    %281 = math.exp %280 : vector<2x32xf32>
    %cst_67 = arith.constant 1.000000e+00 : f32
    %282 = vector.broadcast %cst_67 : f32 to vector<2x32xf32>
    %283 = arith.addf %282, %281 : vector<2x32xf32>
    %284 = arith.divf %282, %283 : vector<2x32xf32>
    %285 = arith.mulf %276, %251 : vector<2x32xf32>
    %286 = arith.mulf %270, %278 : vector<2x32xf32>
    %287 = arith.addf %285, %286 : vector<2x32xf32>
    %288 = math.tanh %287 : vector<2x32xf32>
    %289 = arith.mulf %284, %288 : vector<2x32xf32>
    %290 = arith.index_cast %c7_i32 : i32 to index
    %c0_68 = arith.constant 0 : index
    %c0_69 = arith.constant 0 : index
    %291 = vector.load %arg4[%290, %c0_68, %c0_69] : memref<8x2x32xf32, #tpu.memory_space<vmem>>, vector<1x2x32xf32>
    %292 = vector.shape_cast %291 : vector<1x2x32xf32> to vector<2x32xf32>
    %293 = vector.shape_cast %289 : vector<2x32xf32> to vector<1x2x32xf32>
    tpu.vector_store %arg4[%290, %c0_68, %c0_69], %293 {strides = array<i32>} : memref<8x2x32xf32, #tpu.memory_space<vmem>>, vector<1x2x32xf32>,
    %c8_i32 = arith.constant 8 : i32
    %c0_70 = arith.constant 0 : index
    %c0_71 = arith.constant 0 : index
    %294 = vector.load %arg7[%c0_70, %c0_71] : memref<2x32xf32, #tpu.memory_space<vmem>>, vector<2x32xf32>
    tpu.vector_store %arg7[%c0_70, %c0_71], %289 {strides = array<i32>} : memref<2x32xf32, #tpu.memory_space<vmem>>, vector<2x32xf32>,
    %c0_72 = arith.constant 0 : index
    %c0_73 = arith.constant 0 : index
    %295 = vector.load %arg8[%c0_72, %c0_73] : memref<2x32xf32, #tpu.memory_space<vmem>>, vector<2x32xf32>
    tpu.vector_store %arg8[%c0_72, %c0_73], %287 {strides = array<i32>} : memref<2x32xf32, #tpu.memory_space<vmem>>, vector<2x32xf32>,
    %c0_i32_74 = arith.constant 0 : i32
    %296 = arith.cmpi eq, %arg1, %c0_i32_74 : i32
    %297 = arith.extui %296 : i1 to i32
    %c0_i32_75 = arith.constant 0 : i32
    %298 = arith.cmpi ne, %297, %c0_i32_75 : i32
    scf.if %298 {
      %c0_76 = arith.constant 0 : index
      %c0_77 = arith.constant 0 : index
      %299 = vector.load %arg5[%c0_76, %c0_77] : memref<2x32xf32, #tpu.memory_space<vmem>>, vector<2x32xf32>
      tpu.vector_store %arg5[%c0_76, %c0_77], %289 {strides = array<i32>} : memref<2x32xf32, #tpu.memory_space<vmem>>, vector<2x32xf32>,
      %c0_78 = arith.constant 0 : index
      %c0_79 = arith.constant 0 : index
      %300 = vector.load %arg6[%c0_78, %c0_79] : memref<2x32xf32, #tpu.memory_space<vmem>>, vector<2x32xf32>
      tpu.vector_store %arg6[%c0_78, %c0_79], %287 {strides = array<i32>} : memref<2x32xf32, #tpu.memory_space<vmem>>, vector<2x32xf32>,
    } else {
    }
    return
  }
  func.func @transform_0(%arg0: i32, %arg1: i32) -> (i32, i32, i32) {
    %c0_i32 = arith.constant 0 : i32
    %c0_i32_0 = arith.constant 0 : i32
    return %arg1, %arg0, %c0_i32 : i32, i32, i32
  }
  func.func @transform_1(%arg0: i32, %arg1: i32) -> (i32, i32) {
    %c0_i32 = arith.constant 0 : i32
    %c0_i32_0 = arith.constant 0 : i32
    %c0_i32_1 = arith.constant 0 : i32
    return %c0_i32, %c0_i32_0 : i32, i32
  }
  func.func @transform_2(%arg0: i32, %arg1: i32) -> (i32, i32, i32) {
    %c0_i32 = arith.constant 0 : i32
    %c0_i32_0 = arith.constant 0 : i32
    return %arg1, %arg0, %c0_i32 : i32, i32, i32
  }
  func.func @transform_3(%arg0: i32, %arg1: i32) -> (i32, i32) {
    %c0_i32 = arith.constant 0 : i32
    %c0_i32_0 = arith.constant 0 : i32
    return %arg0, %c0_i32 : i32, i32
  }
  func.func @transform_4(%arg0: i32, %arg1: i32) -> (i32, i32) {
    %c0_i32 = arith.constant 0 : i32
    %c0_i32_0 = arith.constant 0 : i32
    return %arg0, %c0_i32 : i32, i32
  }
}

module attributes {stable_mosaic.version = 11 : i64} {
  func.func @_lstm_recurrent_kernel(%arg0: i32, %arg1: i32, %arg2: memref<8x2x128xbf16, #tpu.memory_space<vmem>>, %arg3: memref<32x128xbf16, #tpu.memory_space<vmem>>, %arg4: memref<8x2x32xbf16, #tpu.memory_space<vmem>>, %arg5: memref<2x32xf32, #tpu.memory_space<vmem>>, %arg6: memref<2x32xf32, #tpu.memory_space<vmem>>, %arg7: memref<2x32xf32, #tpu.memory_space<vmem>>, %arg8: memref<2x32xf32, #tpu.memory_space<vmem>>) attributes {dimension_semantics = [#tpu.dimension_semantics<parallel>, #tpu.dimension_semantics<arbitrary>], iteration_bounds = array<i64: 1, 1>, scalar_prefetch = 0 : i64, scratch_operands = 2 : i64, tpu.core_type = #tpu.core_type<tc>, window_params = [{transform_indices = @transform_0, window_bounds = array<i64: 8, 2, 128>}, {pipeline_mode = #tpu.pipeline_mode<synchronous>, transform_indices = @transform_1, window_bounds = array<i64: 32, 128>}, {transform_indices = @transform_2, window_bounds = array<i64: 8, 2, 32>}, {transform_indices = @transform_3, window_bounds = array<i64: 2, 32>}, {transform_indices = @transform_4, window_bounds = array<i64: 2, 32>}]} {
    %c0_i32 = arith.constant 0 : i32
    %0 = arith.cmpi eq, %arg1, %c0_i32 : i32
    %1 = arith.extui %0 : i1 to i32
    %c0_i32_0 = arith.constant 0 : i32
    %2 = arith.cmpi ne, %1, %c0_i32_0 : i32
    scf.if %2 {
      %cst_76 = arith.constant 0.000000e+00 : f32
      %307 = vector.broadcast %cst_76 : f32 to vector<2x32xf32>
      %c0_77 = arith.constant 0 : index
      %c0_78 = arith.constant 0 : index
      %308 = vector.load %arg7[%c0_77, %c0_78] : memref<2x32xf32, #tpu.memory_space<vmem>>, vector<2x32xf32>
      tpu.vector_store %arg7[%c0_77, %c0_78], %307 {strides = array<i32>} : memref<2x32xf32, #tpu.memory_space<vmem>>, vector<2x32xf32>,
      %cst_79 = arith.constant 0.000000e+00 : f32
      %309 = vector.broadcast %cst_79 : f32 to vector<2x32xf32>
      %c0_80 = arith.constant 0 : index
      %c0_81 = arith.constant 0 : index
      %310 = vector.load %arg8[%c0_80, %c0_81] : memref<2x32xf32, #tpu.memory_space<vmem>>, vector<2x32xf32>
      tpu.vector_store %arg8[%c0_80, %c0_81], %309 {strides = array<i32>} : memref<2x32xf32, #tpu.memory_space<vmem>>, vector<2x32xf32>,
    } else {
    }
    %c0 = arith.constant 0 : index
    %c0_1 = arith.constant 0 : index
    %3 = vector.load %arg3[%c0, %c0_1] : memref<32x128xbf16, #tpu.memory_space<vmem>>, vector<32x128xbf16>
    %c0_2 = arith.constant 0 : index
    %c0_3 = arith.constant 0 : index
    %4 = vector.load %arg7[%c0_2, %c0_3] : memref<2x32xf32, #tpu.memory_space<vmem>>, vector<2x32xf32>
    %c0_4 = arith.constant 0 : index
    %c0_5 = arith.constant 0 : index
    %5 = vector.load %arg8[%c0_4, %c0_5] : memref<2x32xf32, #tpu.memory_space<vmem>>, vector<2x32xf32>
    %c0_i32_6 = arith.constant 0 : i32
    %6 = arith.index_cast %c0_i32_6 : i32 to index
    %c0_7 = arith.constant 0 : index
    %c0_8 = arith.constant 0 : index
    %7 = vector.load %arg2[%6, %c0_7, %c0_8] : memref<8x2x128xbf16, #tpu.memory_space<vmem>>, vector<1x2x128xbf16>
    %8 = vector.shape_cast %7 : vector<1x2x128xbf16> to vector<2x128xbf16>
    %9 = arith.extf %8 : vector<2x128xbf16> to vector<2x128xf32>
    %10 = arith.truncf %4 : vector<2x32xf32> to vector<2x32xbf16>
    %cst = arith.constant dense<0.000000e+00> : vector<2x128xf32>
    %11 = tpu.matmul %10, %3, %cst {dimension_numbers = #tpu.dot_dimension_numbers<[1], [0], [0], [1], [0, 0, 1, 1], [], []>} : vector<2x32xbf16>, vector<32x128xbf16>, vector<2x128xf32> -> vector<2x128xf32>
    %12 = arith.addf %9, %11 : vector<2x128xf32>
    %13 = vector.extract_strided_slice %12 {offsets = [0, 0], sizes = [2, 32], strides = [1, 1]} : vector<2x128xf32> to vector<2x32xf32>
    %14 = arith.negf %13 : vector<2x32xf32>
    %15 = math.exp %14 : vector<2x32xf32>
    %cst_9 = arith.constant 1.000000e+00 : f32
    %16 = vector.broadcast %cst_9 : f32 to vector<2x32xf32>
    %17 = arith.addf %16, %15 : vector<2x32xf32>
    %18 = arith.divf %16, %17 : vector<2x32xf32>
    %19 = vector.extract_strided_slice %12 {offsets = [0, 32], sizes = [2, 32], strides = [1, 1]} : vector<2x128xf32> to vector<2x32xf32>
    %20 = arith.negf %19 : vector<2x32xf32>
    %21 = math.exp %20 : vector<2x32xf32>
    %cst_10 = arith.constant 1.000000e+00 : f32
    %22 = vector.broadcast %cst_10 : f32 to vector<2x32xf32>
    %23 = arith.addf %22, %21 : vector<2x32xf32>
    %24 = arith.divf %22, %23 : vector<2x32xf32>
    %25 = vector.extract_strided_slice %12 {offsets = [0, 64], sizes = [2, 32], strides = [1, 1]} : vector<2x128xf32> to vector<2x32xf32>
    %26 = math.tanh %25 : vector<2x32xf32>
    %27 = vector.extract_strided_slice %12 {offsets = [0, 96], sizes = [2, 32], strides = [1, 1]} : vector<2x128xf32> to vector<2x32xf32>
    %28 = arith.negf %27 : vector<2x32xf32>
    %29 = math.exp %28 : vector<2x32xf32>
    %cst_11 = arith.constant 1.000000e+00 : f32
    %30 = vector.broadcast %cst_11 : f32 to vector<2x32xf32>
    %31 = arith.addf %30, %29 : vector<2x32xf32>
    %32 = arith.divf %30, %31 : vector<2x32xf32>
    %33 = arith.mulf %24, %5 : vector<2x32xf32>
    %34 = arith.mulf %18, %26 : vector<2x32xf32>
    %35 = arith.addf %33, %34 : vector<2x32xf32>
    %36 = math.tanh %35 : vector<2x32xf32>
    %37 = arith.mulf %32, %36 : vector<2x32xf32>
    %38 = arith.truncf %37 : vector<2x32xf32> to vector<2x32xbf16>
    %39 = arith.index_cast %c0_i32_6 : i32 to index
    %c0_12 = arith.constant 0 : index
    %c0_13 = arith.constant 0 : index
    %40 = vector.load %arg4[%39, %c0_12, %c0_13] : memref<8x2x32xbf16, #tpu.memory_space<vmem>>, vector<1x2x32xbf16>
    %41 = vector.shape_cast %40 : vector<1x2x32xbf16> to vector<2x32xbf16>
    %42 = vector.shape_cast %38 : vector<2x32xbf16> to vector<1x2x32xbf16>
    tpu.vector_store %arg4[%39, %c0_12, %c0_13], %42 {strides = array<i32>} : memref<8x2x32xbf16, #tpu.memory_space<vmem>>, vector<1x2x32xbf16>,
    %c1_i32 = arith.constant 1 : i32
    %43 = arith.index_cast %c1_i32 : i32 to index
    %c0_14 = arith.constant 0 : index
    %c0_15 = arith.constant 0 : index
    %44 = vector.load %arg2[%43, %c0_14, %c0_15] : memref<8x2x128xbf16, #tpu.memory_space<vmem>>, vector<1x2x128xbf16>
    %45 = vector.shape_cast %44 : vector<1x2x128xbf16> to vector<2x128xbf16>
    %46 = arith.extf %45 : vector<2x128xbf16> to vector<2x128xf32>
    %47 = arith.truncf %37 : vector<2x32xf32> to vector<2x32xbf16>
    %cst_16 = arith.constant dense<0.000000e+00> : vector<2x128xf32>
    %48 = tpu.matmul %47, %3, %cst_16 {dimension_numbers = #tpu.dot_dimension_numbers<[1], [0], [0], [1], [0, 0, 1, 1], [], []>} : vector<2x32xbf16>, vector<32x128xbf16>, vector<2x128xf32> -> vector<2x128xf32>
    %49 = arith.addf %46, %48 : vector<2x128xf32>
    %50 = vector.extract_strided_slice %49 {offsets = [0, 0], sizes = [2, 32], strides = [1, 1]} : vector<2x128xf32> to vector<2x32xf32>
    %51 = arith.negf %50 : vector<2x32xf32>
    %52 = math.exp %51 : vector<2x32xf32>
    %cst_17 = arith.constant 1.000000e+00 : f32
    %53 = vector.broadcast %cst_17 : f32 to vector<2x32xf32>
    %54 = arith.addf %53, %52 : vector<2x32xf32>
    %55 = arith.divf %53, %54 : vector<2x32xf32>
    %56 = vector.extract_strided_slice %49 {offsets = [0, 32], sizes = [2, 32], strides = [1, 1]} : vector<2x128xf32> to vector<2x32xf32>
    %57 = arith.negf %56 : vector<2x32xf32>
    %58 = math.exp %57 : vector<2x32xf32>
    %cst_18 = arith.constant 1.000000e+00 : f32
    %59 = vector.broadcast %cst_18 : f32 to vector<2x32xf32>
    %60 = arith.addf %59, %58 : vector<2x32xf32>
    %61 = arith.divf %59, %60 : vector<2x32xf32>
    %62 = vector.extract_strided_slice %49 {offsets = [0, 64], sizes = [2, 32], strides = [1, 1]} : vector<2x128xf32> to vector<2x32xf32>
    %63 = math.tanh %62 : vector<2x32xf32>
    %64 = vector.extract_strided_slice %49 {offsets = [0, 96], sizes = [2, 32], strides = [1, 1]} : vector<2x128xf32> to vector<2x32xf32>
    %65 = arith.negf %64 : vector<2x32xf32>
    %66 = math.exp %65 : vector<2x32xf32>
    %cst_19 = arith.constant 1.000000e+00 : f32
    %67 = vector.broadcast %cst_19 : f32 to vector<2x32xf32>
    %68 = arith.addf %67, %66 : vector<2x32xf32>
    %69 = arith.divf %67, %68 : vector<2x32xf32>
    %70 = arith.mulf %61, %35 : vector<2x32xf32>
    %71 = arith.mulf %55, %63 : vector<2x32xf32>
    %72 = arith.addf %70, %71 : vector<2x32xf32>
    %73 = math.tanh %72 : vector<2x32xf32>
    %74 = arith.mulf %69, %73 : vector<2x32xf32>
    %75 = arith.truncf %74 : vector<2x32xf32> to vector<2x32xbf16>
    %76 = arith.index_cast %c1_i32 : i32 to index
    %c0_20 = arith.constant 0 : index
    %c0_21 = arith.constant 0 : index
    %77 = vector.load %arg4[%76, %c0_20, %c0_21] : memref<8x2x32xbf16, #tpu.memory_space<vmem>>, vector<1x2x32xbf16>
    %78 = vector.shape_cast %77 : vector<1x2x32xbf16> to vector<2x32xbf16>
    %79 = vector.shape_cast %75 : vector<2x32xbf16> to vector<1x2x32xbf16>
    tpu.vector_store %arg4[%76, %c0_20, %c0_21], %79 {strides = array<i32>} : memref<8x2x32xbf16, #tpu.memory_space<vmem>>, vector<1x2x32xbf16>,
    %c2_i32 = arith.constant 2 : i32
    %80 = arith.index_cast %c2_i32 : i32 to index
    %c0_22 = arith.constant 0 : index
    %c0_23 = arith.constant 0 : index
    %81 = vector.load %arg2[%80, %c0_22, %c0_23] : memref<8x2x128xbf16, #tpu.memory_space<vmem>>, vector<1x2x128xbf16>
    %82 = vector.shape_cast %81 : vector<1x2x128xbf16> to vector<2x128xbf16>
    %83 = arith.extf %82 : vector<2x128xbf16> to vector<2x128xf32>
    %84 = arith.truncf %74 : vector<2x32xf32> to vector<2x32xbf16>
    %cst_24 = arith.constant dense<0.000000e+00> : vector<2x128xf32>
    %85 = tpu.matmul %84, %3, %cst_24 {dimension_numbers = #tpu.dot_dimension_numbers<[1], [0], [0], [1], [0, 0, 1, 1], [], []>} : vector<2x32xbf16>, vector<32x128xbf16>, vector<2x128xf32> -> vector<2x128xf32>
    %86 = arith.addf %83, %85 : vector<2x128xf32>
    %87 = vector.extract_strided_slice %86 {offsets = [0, 0], sizes = [2, 32], strides = [1, 1]} : vector<2x128xf32> to vector<2x32xf32>
    %88 = arith.negf %87 : vector<2x32xf32>
    %89 = math.exp %88 : vector<2x32xf32>
    %cst_25 = arith.constant 1.000000e+00 : f32
    %90 = vector.broadcast %cst_25 : f32 to vector<2x32xf32>
    %91 = arith.addf %90, %89 : vector<2x32xf32>
    %92 = arith.divf %90, %91 : vector<2x32xf32>
    %93 = vector.extract_strided_slice %86 {offsets = [0, 32], sizes = [2, 32], strides = [1, 1]} : vector<2x128xf32> to vector<2x32xf32>
    %94 = arith.negf %93 : vector<2x32xf32>
    %95 = math.exp %94 : vector<2x32xf32>
    %cst_26 = arith.constant 1.000000e+00 : f32
    %96 = vector.broadcast %cst_26 : f32 to vector<2x32xf32>
    %97 = arith.addf %96, %95 : vector<2x32xf32>
    %98 = arith.divf %96, %97 : vector<2x32xf32>
    %99 = vector.extract_strided_slice %86 {offsets = [0, 64], sizes = [2, 32], strides = [1, 1]} : vector<2x128xf32> to vector<2x32xf32>
    %100 = math.tanh %99 : vector<2x32xf32>
    %101 = vector.extract_strided_slice %86 {offsets = [0, 96], sizes = [2, 32], strides = [1, 1]} : vector<2x128xf32> to vector<2x32xf32>
    %102 = arith.negf %101 : vector<2x32xf32>
    %103 = math.exp %102 : vector<2x32xf32>
    %cst_27 = arith.constant 1.000000e+00 : f32
    %104 = vector.broadcast %cst_27 : f32 to vector<2x32xf32>
    %105 = arith.addf %104, %103 : vector<2x32xf32>
    %106 = arith.divf %104, %105 : vector<2x32xf32>
    %107 = arith.mulf %98, %72 : vector<2x32xf32>
    %108 = arith.mulf %92, %100 : vector<2x32xf32>
    %109 = arith.addf %107, %108 : vector<2x32xf32>
    %110 = math.tanh %109 : vector<2x32xf32>
    %111 = arith.mulf %106, %110 : vector<2x32xf32>
    %112 = arith.truncf %111 : vector<2x32xf32> to vector<2x32xbf16>
    %113 = arith.index_cast %c2_i32 : i32 to index
    %c0_28 = arith.constant 0 : index
    %c0_29 = arith.constant 0 : index
    %114 = vector.load %arg4[%113, %c0_28, %c0_29] : memref<8x2x32xbf16, #tpu.memory_space<vmem>>, vector<1x2x32xbf16>
    %115 = vector.shape_cast %114 : vector<1x2x32xbf16> to vector<2x32xbf16>
    %116 = vector.shape_cast %112 : vector<2x32xbf16> to vector<1x2x32xbf16>
    tpu.vector_store %arg4[%113, %c0_28, %c0_29], %116 {strides = array<i32>} : memref<8x2x32xbf16, #tpu.memory_space<vmem>>, vector<1x2x32xbf16>,
    %c3_i32 = arith.constant 3 : i32
    %117 = arith.index_cast %c3_i32 : i32 to index
    %c0_30 = arith.constant 0 : index
    %c0_31 = arith.constant 0 : index
    %118 = vector.load %arg2[%117, %c0_30, %c0_31] : memref<8x2x128xbf16, #tpu.memory_space<vmem>>, vector<1x2x128xbf16>
    %119 = vector.shape_cast %118 : vector<1x2x128xbf16> to vector<2x128xbf16>
    %120 = arith.extf %119 : vector<2x128xbf16> to vector<2x128xf32>
    %121 = arith.truncf %111 : vector<2x32xf32> to vector<2x32xbf16>
    %cst_32 = arith.constant dense<0.000000e+00> : vector<2x128xf32>
    %122 = tpu.matmul %121, %3, %cst_32 {dimension_numbers = #tpu.dot_dimension_numbers<[1], [0], [0], [1], [0, 0, 1, 1], [], []>} : vector<2x32xbf16>, vector<32x128xbf16>, vector<2x128xf32> -> vector<2x128xf32>
    %123 = arith.addf %120, %122 : vector<2x128xf32>
    %124 = vector.extract_strided_slice %123 {offsets = [0, 0], sizes = [2, 32], strides = [1, 1]} : vector<2x128xf32> to vector<2x32xf32>
    %125 = arith.negf %124 : vector<2x32xf32>
    %126 = math.exp %125 : vector<2x32xf32>
    %cst_33 = arith.constant 1.000000e+00 : f32
    %127 = vector.broadcast %cst_33 : f32 to vector<2x32xf32>
    %128 = arith.addf %127, %126 : vector<2x32xf32>
    %129 = arith.divf %127, %128 : vector<2x32xf32>
    %130 = vector.extract_strided_slice %123 {offsets = [0, 32], sizes = [2, 32], strides = [1, 1]} : vector<2x128xf32> to vector<2x32xf32>
    %131 = arith.negf %130 : vector<2x32xf32>
    %132 = math.exp %131 : vector<2x32xf32>
    %cst_34 = arith.constant 1.000000e+00 : f32
    %133 = vector.broadcast %cst_34 : f32 to vector<2x32xf32>
    %134 = arith.addf %133, %132 : vector<2x32xf32>
    %135 = arith.divf %133, %134 : vector<2x32xf32>
    %136 = vector.extract_strided_slice %123 {offsets = [0, 64], sizes = [2, 32], strides = [1, 1]} : vector<2x128xf32> to vector<2x32xf32>
    %137 = math.tanh %136 : vector<2x32xf32>
    %138 = vector.extract_strided_slice %123 {offsets = [0, 96], sizes = [2, 32], strides = [1, 1]} : vector<2x128xf32> to vector<2x32xf32>
    %139 = arith.negf %138 : vector<2x32xf32>
    %140 = math.exp %139 : vector<2x32xf32>
    %cst_35 = arith.constant 1.000000e+00 : f32
    %141 = vector.broadcast %cst_35 : f32 to vector<2x32xf32>
    %142 = arith.addf %141, %140 : vector<2x32xf32>
    %143 = arith.divf %141, %142 : vector<2x32xf32>
    %144 = arith.mulf %135, %109 : vector<2x32xf32>
    %145 = arith.mulf %129, %137 : vector<2x32xf32>
    %146 = arith.addf %144, %145 : vector<2x32xf32>
    %147 = math.tanh %146 : vector<2x32xf32>
    %148 = arith.mulf %143, %147 : vector<2x32xf32>
    %149 = arith.truncf %148 : vector<2x32xf32> to vector<2x32xbf16>
    %150 = arith.index_cast %c3_i32 : i32 to index
    %c0_36 = arith.constant 0 : index
    %c0_37 = arith.constant 0 : index
    %151 = vector.load %arg4[%150, %c0_36, %c0_37] : memref<8x2x32xbf16, #tpu.memory_space<vmem>>, vector<1x2x32xbf16>
    %152 = vector.shape_cast %151 : vector<1x2x32xbf16> to vector<2x32xbf16>
    %153 = vector.shape_cast %149 : vector<2x32xbf16> to vector<1x2x32xbf16>
    tpu.vector_store %arg4[%150, %c0_36, %c0_37], %153 {strides = array<i32>} : memref<8x2x32xbf16, #tpu.memory_space<vmem>>, vector<1x2x32xbf16>,
    %c4_i32 = arith.constant 4 : i32
    %154 = arith.index_cast %c4_i32 : i32 to index
    %c0_38 = arith.constant 0 : index
    %c0_39 = arith.constant 0 : index
    %155 = vector.load %arg2[%154, %c0_38, %c0_39] : memref<8x2x128xbf16, #tpu.memory_space<vmem>>, vector<1x2x128xbf16>
    %156 = vector.shape_cast %155 : vector<1x2x128xbf16> to vector<2x128xbf16>
    %157 = arith.extf %156 : vector<2x128xbf16> to vector<2x128xf32>
    %158 = arith.truncf %148 : vector<2x32xf32> to vector<2x32xbf16>
    %cst_40 = arith.constant dense<0.000000e+00> : vector<2x128xf32>
    %159 = tpu.matmul %158, %3, %cst_40 {dimension_numbers = #tpu.dot_dimension_numbers<[1], [0], [0], [1], [0, 0, 1, 1], [], []>} : vector<2x32xbf16>, vector<32x128xbf16>, vector<2x128xf32> -> vector<2x128xf32>
    %160 = arith.addf %157, %159 : vector<2x128xf32>
    %161 = vector.extract_strided_slice %160 {offsets = [0, 0], sizes = [2, 32], strides = [1, 1]} : vector<2x128xf32> to vector<2x32xf32>
    %162 = arith.negf %161 : vector<2x32xf32>
    %163 = math.exp %162 : vector<2x32xf32>
    %cst_41 = arith.constant 1.000000e+00 : f32
    %164 = vector.broadcast %cst_41 : f32 to vector<2x32xf32>
    %165 = arith.addf %164, %163 : vector<2x32xf32>
    %166 = arith.divf %164, %165 : vector<2x32xf32>
    %167 = vector.extract_strided_slice %160 {offsets = [0, 32], sizes = [2, 32], strides = [1, 1]} : vector<2x128xf32> to vector<2x32xf32>
    %168 = arith.negf %167 : vector<2x32xf32>
    %169 = math.exp %168 : vector<2x32xf32>
    %cst_42 = arith.constant 1.000000e+00 : f32
    %170 = vector.broadcast %cst_42 : f32 to vector<2x32xf32>
    %171 = arith.addf %170, %169 : vector<2x32xf32>
    %172 = arith.divf %170, %171 : vector<2x32xf32>
    %173 = vector.extract_strided_slice %160 {offsets = [0, 64], sizes = [2, 32], strides = [1, 1]} : vector<2x128xf32> to vector<2x32xf32>
    %174 = math.tanh %173 : vector<2x32xf32>
    %175 = vector.extract_strided_slice %160 {offsets = [0, 96], sizes = [2, 32], strides = [1, 1]} : vector<2x128xf32> to vector<2x32xf32>
    %176 = arith.negf %175 : vector<2x32xf32>
    %177 = math.exp %176 : vector<2x32xf32>
    %cst_43 = arith.constant 1.000000e+00 : f32
    %178 = vector.broadcast %cst_43 : f32 to vector<2x32xf32>
    %179 = arith.addf %178, %177 : vector<2x32xf32>
    %180 = arith.divf %178, %179 : vector<2x32xf32>
    %181 = arith.mulf %172, %146 : vector<2x32xf32>
    %182 = arith.mulf %166, %174 : vector<2x32xf32>
    %183 = arith.addf %181, %182 : vector<2x32xf32>
    %184 = math.tanh %183 : vector<2x32xf32>
    %185 = arith.mulf %180, %184 : vector<2x32xf32>
    %186 = arith.truncf %185 : vector<2x32xf32> to vector<2x32xbf16>
    %187 = arith.index_cast %c4_i32 : i32 to index
    %c0_44 = arith.constant 0 : index
    %c0_45 = arith.constant 0 : index
    %188 = vector.load %arg4[%187, %c0_44, %c0_45] : memref<8x2x32xbf16, #tpu.memory_space<vmem>>, vector<1x2x32xbf16>
    %189 = vector.shape_cast %188 : vector<1x2x32xbf16> to vector<2x32xbf16>
    %190 = vector.shape_cast %186 : vector<2x32xbf16> to vector<1x2x32xbf16>
    tpu.vector_store %arg4[%187, %c0_44, %c0_45], %190 {strides = array<i32>} : memref<8x2x32xbf16, #tpu.memory_space<vmem>>, vector<1x2x32xbf16>,
    %c5_i32 = arith.constant 5 : i32
    %191 = arith.index_cast %c5_i32 : i32 to index
    %c0_46 = arith.constant 0 : index
    %c0_47 = arith.constant 0 : index
    %192 = vector.load %arg2[%191, %c0_46, %c0_47] : memref<8x2x128xbf16, #tpu.memory_space<vmem>>, vector<1x2x128xbf16>
    %193 = vector.shape_cast %192 : vector<1x2x128xbf16> to vector<2x128xbf16>
    %194 = arith.extf %193 : vector<2x128xbf16> to vector<2x128xf32>
    %195 = arith.truncf %185 : vector<2x32xf32> to vector<2x32xbf16>
    %cst_48 = arith.constant dense<0.000000e+00> : vector<2x128xf32>
    %196 = tpu.matmul %195, %3, %cst_48 {dimension_numbers = #tpu.dot_dimension_numbers<[1], [0], [0], [1], [0, 0, 1, 1], [], []>} : vector<2x32xbf16>, vector<32x128xbf16>, vector<2x128xf32> -> vector<2x128xf32>
    %197 = arith.addf %194, %196 : vector<2x128xf32>
    %198 = vector.extract_strided_slice %197 {offsets = [0, 0], sizes = [2, 32], strides = [1, 1]} : vector<2x128xf32> to vector<2x32xf32>
    %199 = arith.negf %198 : vector<2x32xf32>
    %200 = math.exp %199 : vector<2x32xf32>
    %cst_49 = arith.constant 1.000000e+00 : f32
    %201 = vector.broadcast %cst_49 : f32 to vector<2x32xf32>
    %202 = arith.addf %201, %200 : vector<2x32xf32>
    %203 = arith.divf %201, %202 : vector<2x32xf32>
    %204 = vector.extract_strided_slice %197 {offsets = [0, 32], sizes = [2, 32], strides = [1, 1]} : vector<2x128xf32> to vector<2x32xf32>
    %205 = arith.negf %204 : vector<2x32xf32>
    %206 = math.exp %205 : vector<2x32xf32>
    %cst_50 = arith.constant 1.000000e+00 : f32
    %207 = vector.broadcast %cst_50 : f32 to vector<2x32xf32>
    %208 = arith.addf %207, %206 : vector<2x32xf32>
    %209 = arith.divf %207, %208 : vector<2x32xf32>
    %210 = vector.extract_strided_slice %197 {offsets = [0, 64], sizes = [2, 32], strides = [1, 1]} : vector<2x128xf32> to vector<2x32xf32>
    %211 = math.tanh %210 : vector<2x32xf32>
    %212 = vector.extract_strided_slice %197 {offsets = [0, 96], sizes = [2, 32], strides = [1, 1]} : vector<2x128xf32> to vector<2x32xf32>
    %213 = arith.negf %212 : vector<2x32xf32>
    %214 = math.exp %213 : vector<2x32xf32>
    %cst_51 = arith.constant 1.000000e+00 : f32
    %215 = vector.broadcast %cst_51 : f32 to vector<2x32xf32>
    %216 = arith.addf %215, %214 : vector<2x32xf32>
    %217 = arith.divf %215, %216 : vector<2x32xf32>
    %218 = arith.mulf %209, %183 : vector<2x32xf32>
    %219 = arith.mulf %203, %211 : vector<2x32xf32>
    %220 = arith.addf %218, %219 : vector<2x32xf32>
    %221 = math.tanh %220 : vector<2x32xf32>
    %222 = arith.mulf %217, %221 : vector<2x32xf32>
    %223 = arith.truncf %222 : vector<2x32xf32> to vector<2x32xbf16>
    %224 = arith.index_cast %c5_i32 : i32 to index
    %c0_52 = arith.constant 0 : index
    %c0_53 = arith.constant 0 : index
    %225 = vector.load %arg4[%224, %c0_52, %c0_53] : memref<8x2x32xbf16, #tpu.memory_space<vmem>>, vector<1x2x32xbf16>
    %226 = vector.shape_cast %225 : vector<1x2x32xbf16> to vector<2x32xbf16>
    %227 = vector.shape_cast %223 : vector<2x32xbf16> to vector<1x2x32xbf16>
    tpu.vector_store %arg4[%224, %c0_52, %c0_53], %227 {strides = array<i32>} : memref<8x2x32xbf16, #tpu.memory_space<vmem>>, vector<1x2x32xbf16>,
    %c6_i32 = arith.constant 6 : i32
    %228 = arith.index_cast %c6_i32 : i32 to index
    %c0_54 = arith.constant 0 : index
    %c0_55 = arith.constant 0 : index
    %229 = vector.load %arg2[%228, %c0_54, %c0_55] : memref<8x2x128xbf16, #tpu.memory_space<vmem>>, vector<1x2x128xbf16>
    %230 = vector.shape_cast %229 : vector<1x2x128xbf16> to vector<2x128xbf16>
    %231 = arith.extf %230 : vector<2x128xbf16> to vector<2x128xf32>
    %232 = arith.truncf %222 : vector<2x32xf32> to vector<2x32xbf16>
    %cst_56 = arith.constant dense<0.000000e+00> : vector<2x128xf32>
    %233 = tpu.matmul %232, %3, %cst_56 {dimension_numbers = #tpu.dot_dimension_numbers<[1], [0], [0], [1], [0, 0, 1, 1], [], []>} : vector<2x32xbf16>, vector<32x128xbf16>, vector<2x128xf32> -> vector<2x128xf32>
    %234 = arith.addf %231, %233 : vector<2x128xf32>
    %235 = vector.extract_strided_slice %234 {offsets = [0, 0], sizes = [2, 32], strides = [1, 1]} : vector<2x128xf32> to vector<2x32xf32>
    %236 = arith.negf %235 : vector<2x32xf32>
    %237 = math.exp %236 : vector<2x32xf32>
    %cst_57 = arith.constant 1.000000e+00 : f32
    %238 = vector.broadcast %cst_57 : f32 to vector<2x32xf32>
    %239 = arith.addf %238, %237 : vector<2x32xf32>
    %240 = arith.divf %238, %239 : vector<2x32xf32>
    %241 = vector.extract_strided_slice %234 {offsets = [0, 32], sizes = [2, 32], strides = [1, 1]} : vector<2x128xf32> to vector<2x32xf32>
    %242 = arith.negf %241 : vector<2x32xf32>
    %243 = math.exp %242 : vector<2x32xf32>
    %cst_58 = arith.constant 1.000000e+00 : f32
    %244 = vector.broadcast %cst_58 : f32 to vector<2x32xf32>
    %245 = arith.addf %244, %243 : vector<2x32xf32>
    %246 = arith.divf %244, %245 : vector<2x32xf32>
    %247 = vector.extract_strided_slice %234 {offsets = [0, 64], sizes = [2, 32], strides = [1, 1]} : vector<2x128xf32> to vector<2x32xf32>
    %248 = math.tanh %247 : vector<2x32xf32>
    %249 = vector.extract_strided_slice %234 {offsets = [0, 96], sizes = [2, 32], strides = [1, 1]} : vector<2x128xf32> to vector<2x32xf32>
    %250 = arith.negf %249 : vector<2x32xf32>
    %251 = math.exp %250 : vector<2x32xf32>
    %cst_59 = arith.constant 1.000000e+00 : f32
    %252 = vector.broadcast %cst_59 : f32 to vector<2x32xf32>
    %253 = arith.addf %252, %251 : vector<2x32xf32>
    %254 = arith.divf %252, %253 : vector<2x32xf32>
    %255 = arith.mulf %246, %220 : vector<2x32xf32>
    %256 = arith.mulf %240, %248 : vector<2x32xf32>
    %257 = arith.addf %255, %256 : vector<2x32xf32>
    %258 = math.tanh %257 : vector<2x32xf32>
    %259 = arith.mulf %254, %258 : vector<2x32xf32>
    %260 = arith.truncf %259 : vector<2x32xf32> to vector<2x32xbf16>
    %261 = arith.index_cast %c6_i32 : i32 to index
    %c0_60 = arith.constant 0 : index
    %c0_61 = arith.constant 0 : index
    %262 = vector.load %arg4[%261, %c0_60, %c0_61] : memref<8x2x32xbf16, #tpu.memory_space<vmem>>, vector<1x2x32xbf16>
    %263 = vector.shape_cast %262 : vector<1x2x32xbf16> to vector<2x32xbf16>
    %264 = vector.shape_cast %260 : vector<2x32xbf16> to vector<1x2x32xbf16>
    tpu.vector_store %arg4[%261, %c0_60, %c0_61], %264 {strides = array<i32>} : memref<8x2x32xbf16, #tpu.memory_space<vmem>>, vector<1x2x32xbf16>,
    %c7_i32 = arith.constant 7 : i32
    %265 = arith.index_cast %c7_i32 : i32 to index
    %c0_62 = arith.constant 0 : index
    %c0_63 = arith.constant 0 : index
    %266 = vector.load %arg2[%265, %c0_62, %c0_63] : memref<8x2x128xbf16, #tpu.memory_space<vmem>>, vector<1x2x128xbf16>
    %267 = vector.shape_cast %266 : vector<1x2x128xbf16> to vector<2x128xbf16>
    %268 = arith.extf %267 : vector<2x128xbf16> to vector<2x128xf32>
    %269 = arith.truncf %259 : vector<2x32xf32> to vector<2x32xbf16>
    %cst_64 = arith.constant dense<0.000000e+00> : vector<2x128xf32>
    %270 = tpu.matmul %269, %3, %cst_64 {dimension_numbers = #tpu.dot_dimension_numbers<[1], [0], [0], [1], [0, 0, 1, 1], [], []>} : vector<2x32xbf16>, vector<32x128xbf16>, vector<2x128xf32> -> vector<2x128xf32>
    %271 = arith.addf %268, %270 : vector<2x128xf32>
    %272 = vector.extract_strided_slice %271 {offsets = [0, 0], sizes = [2, 32], strides = [1, 1]} : vector<2x128xf32> to vector<2x32xf32>
    %273 = arith.negf %272 : vector<2x32xf32>
    %274 = math.exp %273 : vector<2x32xf32>
    %cst_65 = arith.constant 1.000000e+00 : f32
    %275 = vector.broadcast %cst_65 : f32 to vector<2x32xf32>
    %276 = arith.addf %275, %274 : vector<2x32xf32>
    %277 = arith.divf %275, %276 : vector<2x32xf32>
    %278 = vector.extract_strided_slice %271 {offsets = [0, 32], sizes = [2, 32], strides = [1, 1]} : vector<2x128xf32> to vector<2x32xf32>
    %279 = arith.negf %278 : vector<2x32xf32>
    %280 = math.exp %279 : vector<2x32xf32>
    %cst_66 = arith.constant 1.000000e+00 : f32
    %281 = vector.broadcast %cst_66 : f32 to vector<2x32xf32>
    %282 = arith.addf %281, %280 : vector<2x32xf32>
    %283 = arith.divf %281, %282 : vector<2x32xf32>
    %284 = vector.extract_strided_slice %271 {offsets = [0, 64], sizes = [2, 32], strides = [1, 1]} : vector<2x128xf32> to vector<2x32xf32>
    %285 = math.tanh %284 : vector<2x32xf32>
    %286 = vector.extract_strided_slice %271 {offsets = [0, 96], sizes = [2, 32], strides = [1, 1]} : vector<2x128xf32> to vector<2x32xf32>
    %287 = arith.negf %286 : vector<2x32xf32>
    %288 = math.exp %287 : vector<2x32xf32>
    %cst_67 = arith.constant 1.000000e+00 : f32
    %289 = vector.broadcast %cst_67 : f32 to vector<2x32xf32>
    %290 = arith.addf %289, %288 : vector<2x32xf32>
    %291 = arith.divf %289, %290 : vector<2x32xf32>
    %292 = arith.mulf %283, %257 : vector<2x32xf32>
    %293 = arith.mulf %277, %285 : vector<2x32xf32>
    %294 = arith.addf %292, %293 : vector<2x32xf32>
    %295 = math.tanh %294 : vector<2x32xf32>
    %296 = arith.mulf %291, %295 : vector<2x32xf32>
    %297 = arith.truncf %296 : vector<2x32xf32> to vector<2x32xbf16>
    %298 = arith.index_cast %c7_i32 : i32 to index
    %c0_68 = arith.constant 0 : index
    %c0_69 = arith.constant 0 : index
    %299 = vector.load %arg4[%298, %c0_68, %c0_69] : memref<8x2x32xbf16, #tpu.memory_space<vmem>>, vector<1x2x32xbf16>
    %300 = vector.shape_cast %299 : vector<1x2x32xbf16> to vector<2x32xbf16>
    %301 = vector.shape_cast %297 : vector<2x32xbf16> to vector<1x2x32xbf16>
    tpu.vector_store %arg4[%298, %c0_68, %c0_69], %301 {strides = array<i32>} : memref<8x2x32xbf16, #tpu.memory_space<vmem>>, vector<1x2x32xbf16>,
    %c8_i32 = arith.constant 8 : i32
    %c0_70 = arith.constant 0 : index
    %c0_71 = arith.constant 0 : index
    %302 = vector.load %arg7[%c0_70, %c0_71] : memref<2x32xf32, #tpu.memory_space<vmem>>, vector<2x32xf32>
    tpu.vector_store %arg7[%c0_70, %c0_71], %296 {strides = array<i32>} : memref<2x32xf32, #tpu.memory_space<vmem>>, vector<2x32xf32>,
    %c0_72 = arith.constant 0 : index
    %c0_73 = arith.constant 0 : index
    %303 = vector.load %arg8[%c0_72, %c0_73] : memref<2x32xf32, #tpu.memory_space<vmem>>, vector<2x32xf32>
    tpu.vector_store %arg8[%c0_72, %c0_73], %294 {strides = array<i32>} : memref<2x32xf32, #tpu.memory_space<vmem>>, vector<2x32xf32>,
    %c0_i32_74 = arith.constant 0 : i32
    %304 = arith.cmpi eq, %arg1, %c0_i32_74 : i32
    %305 = arith.extui %304 : i1 to i32
    %c0_i32_75 = arith.constant 0 : i32
    %306 = arith.cmpi ne, %305, %c0_i32_75 : i32
    scf.if %306 {
      %c0_76 = arith.constant 0 : index
      %c0_77 = arith.constant 0 : index
      %307 = vector.load %arg5[%c0_76, %c0_77] : memref<2x32xf32, #tpu.memory_space<vmem>>, vector<2x32xf32>
      tpu.vector_store %arg5[%c0_76, %c0_77], %296 {strides = array<i32>} : memref<2x32xf32, #tpu.memory_space<vmem>>, vector<2x32xf32>,
      %c0_78 = arith.constant 0 : index
      %c0_79 = arith.constant 0 : index
      %308 = vector.load %arg6[%c0_78, %c0_79] : memref<2x32xf32, #tpu.memory_space<vmem>>, vector<2x32xf32>
      tpu.vector_store %arg6[%c0_78, %c0_79], %294 {strides = array<i32>} : memref<2x32xf32, #tpu.memory_space<vmem>>, vector<2x32xf32>,
    } else {
    }
    return
  }
  func.func @transform_0(%arg0: i32, %arg1: i32) -> (i32, i32, i32) {
    %c0_i32 = arith.constant 0 : i32
    %c0_i32_0 = arith.constant 0 : i32
    return %arg1, %arg0, %c0_i32 : i32, i32, i32
  }
  func.func @transform_1(%arg0: i32, %arg1: i32) -> (i32, i32) {
    %c0_i32 = arith.constant 0 : i32
    %c0_i32_0 = arith.constant 0 : i32
    %c0_i32_1 = arith.constant 0 : i32
    return %c0_i32, %c0_i32_0 : i32, i32
  }
  func.func @transform_2(%arg0: i32, %arg1: i32) -> (i32, i32, i32) {
    %c0_i32 = arith.constant 0 : i32
    %c0_i32_0 = arith.constant 0 : i32
    return %arg1, %arg0, %c0_i32 : i32, i32, i32
  }
  func.func @transform_3(%arg0: i32, %arg1: i32) -> (i32, i32) {
    %c0_i32 = arith.constant 0 : i32
    %c0_i32_0 = arith.constant 0 : i32
    return %arg0, %c0_i32 : i32, i32
  }
  func.func @transform_4(%arg0: i32, %arg1: i32) -> (i32, i32) {
    %c0_i32 = arith.constant 0 : i32
    %c0_i32_0 = arith.constant 0 : i32
    return %arg0, %c0_i32 : i32, i32
  }
}

</mosaic_0001>

<bundles_post_ra>
// kernel: lstm_weight_drop_forward.2
= control target key start
LH: loop header
LB: loop body
LE: loop exit
PB: predicated region body
PF: predicated region fallthrough
CT: control target
= control target key end

     0   :  { %vm19_vm0 = vcmask 254976   ;;  %v1038_v0 = vmov 0.0   ;;  %vm1039_vm1 = vmmov 0   ;;  %vm43_vm2 = vcmask 261120   ;;  %s1040_s20 = smov 64   ;;  %s1041_s21 = smov 32   ;;  %s1271_s1 = inlined_call_operand.vmem [shape: bf16[32,128], index: 1, kind: input, shape index: {}]   ;;  %s1272_s0 = inlined_call_operand.vmem [shape: bf16[8,2,128], index: 0, kind: input, shape index: {}]   ;;  %s1273_s2 = inlined_call_operand.vmem [shape: bf16[8,2,32], index: 2, kind: output, shape index: {0}]   ;;  %s1274_s3 = inlined_call_operand.vmem [shape: f32[2,32], index: 3, kind: output, shape index: {1}]   ;;  %s1275_s4 = inlined_call_operand.vmem [shape: f32[2,32], index: 4, kind: output, shape index: {2}]  }
   0x1   :  { %901 = vmatprep.subr.bf16.mxu0 %v1038_v0  ;;  %v1074_v1 = vld [vmem:[%s1271_s1] sm:$0xff]   ;;  %905 = vmatprep.mubr.msk.bf16.mxu0 %vm1039_vm1, %v1038_v0  ;;  %20 = vst.msk [vmem:[#allocation2] sm:$0x3] %vm19_vm0, %v1038_v0  ;;  %21 = vst.msk [vmem:[#allocation3] sm:$0x3] %vm19_vm0, %v1038_v0  ;;  %v1089_v2 = vld [vmem:[%s1271_s1 + $0x8] sm:$0xff]  }
   0x2   :  { %909 = vmatprep.subr.bf16.mxu1 %v1038_v0  ;;  %913 = vmatprep.mubr.msk.bf16.mxu1 %vm1039_vm1, %v1038_v0  ;;  %v28_v5 = vld [vmem:[%s1272_s0] sm:$0x1]  ;;  %v849_v29 = vld [vmem:[%s1272_s0 + $0x1] sm:$0x1]  ;;  %v853_v51 = vld [vmem:[%s1272_s0 + $0x2] sm:$0x1] }
   0x3   :  { %902 = vmatpush3.bf16.msra.mxu0 %v1074_v1  ;;  %910 = vmatpush3.bf16.msra.mxu1 %v1074_v1  ;;  %v29_v6 = vunpack.c.l.bf16 %v28_v5  ;;  %v146_v30 = vunpack.c.l.bf16 %v849_v29  ;;  %v240_v52 = vunpack.c.l.bf16 %v853_v51  ;;  %vm142_vm3 = vcmask 253952   ;;  %s1044_s23 = smov 96  }
   0x4   :  { %903 = vmatprep.subr.bf16.mxu0 %v1038_v0  ;;  %911 = vmatprep.subr.bf16.mxu1 %v1038_v0 }
   0x7   :  { %904 = vmatpush3.bf16.msra.mxu0 %v1089_v2  ;;  %912 = vmatpush3.bf16.msra.mxu1 %v1089_v2 }
   0x8   :  { %v26_v3 = vld [vmem:[#allocation2] sm:$0x3]  ;;  %917 = vmatprep.subr.bf16.mxu0 %v1038_v0  ;;  %925 = vmatprep.subr.bf16.mxu1 %v1038_v0  ;;  %v848_v13 = vld.sshfl [vmem:[#allocation3] sm:$0x3 pattern:$0x76325410] }
   0x9   :  { %v30_v4 = vpack.c.bf16 %v26_v3, %v26_v3 }
   0xb   :  { %906 = vmatmul.mubr.msk.bf16.vlgmr.msra.gmra.mrb[0].mxu0 %vm43_vm2, %v30_v4 }
   0xc   :  { %918 = vmatpush3.bf16.msra.mxu0 %v1074_v1  ;;  %921 = vmatprep.mubr.msk.bf16.mxu0 %vm1039_vm1, %v1038_v0 }
   0xd   :  { %919 = vmatprep.subr.bf16.mxu0 %v1038_v0 }
  0x10   :  { %920 = vmatpush3.bf16.msra.mxu0 %v1089_v2 }
  0x11   :  { %933 = vmatprep.subr.bf16.mxu0 %v1038_v0 }
  0xde   :  { %v81_v7 = vpop.f32.mrb[0].mxu0 }
  0xdf   :  { %v87_v8 = vadd.f32 %v81_v7, %v29_v6  ;;  %v907_v9 = vpop.f32.mrb[1].mxu0 }
  0xe0   :  { %v84_v10 = vpop.f32.mrb[2].mxu0 }
  0xe1   :  { %974 = vtanh.f32 %v87_v8  ;;  %v908_v11 = vpop.f32.mrb[3].mxu0  ;;  %v847_v14 = vmul.f32 -1.442695, %v87_v8 }
  0xe3   :  { %976 = vpow2.f32 %v847_v14 }
  0xeb   :  { %v975_v12 = vpop.eup %974 }
  0xec   :  { %108 = vrot.lane.b32.xlu0 %v975_v12, %s1040_s20  ;;  %v857_v12 = vld [vmem:[%s1272_s0 + $0x3] sm:$0x1] }
  0xed   :  { %v977_v15 = vpop.eup %976 }
  0xee   :  { %v91_v16 = vadd.f32 1.0, %v977_v15 }
  0xf0   :  { %103 = vrot.lane.b32.xlu0 %v848_v13, %s1041_s21  ;;  %978 = vrcp.f32 %v91_v16  ;;  %v334_v13 = vunpack.c.l.bf16 %v857_v12 }
  0xfa   :  { %v979_v17 = vpop.eup %978 }
 0x15e   :  { %v109_v18 = vpop.permute.xlu0 %108 }
 0x15f   :  { %v111_v19 = vmul.f32 %v979_v17, %v109_v18 }
 0x161   :  { %113 = vrot.lane.b32.xlu1 %v111_v19, %s1041_s21 }
 0x162   :  { %v104_v20 = vpop.permute.xlu0 %103 }
 0x163   :  { %v106_v21 = vmul.f32 %v979_v17, %v104_v20 }
 0x1d3   :  { %v114_v22 = vpop.permute.xlu1 %113 }
 0x1d4   :  { %v116_v23 = vadd.f32 %v114_v22, %v106_v21 }
 0x1d6   :  { %980 = vtanh.f32 %v116_v23 }
 0x1e0   :  { %v981_v24 = vpop.eup %980 }
 0x1e1   :  { %119 = vrot.lane.b32.xlu1 %v981_v24, %s1040_s20 }
 0x253   :  { %v120_v25 = vpop.permute.xlu1 %119 }
 0x254   :  { %v122_v26 = vmul.f32 %v979_v17, %v120_v25 }
 0x256   :  { %v1112_v27 = vpack.c.bf16 %v122_v26, %v122_v26 }
 0x258   :  { %147 = vrot.lane.b32.xlu0 %v1112_v27, %s1041_s21 }
 0x2ca   :  { %v148_v28 = vpop.permute.xlu0 %147 }
 0x2cb   :  { %914 = vmatmul.mubr.msk.bf16.vlgmr.msra.gmra.mrb[0].mxu1 %vm43_vm2, %v148_v28 }
 0x2cc   :  { %926 = vmatpush3.bf16.msra.mxu1 %v1074_v1  ;;  %929 = vmatprep.mubr.msk.bf16.mxu1 %vm1039_vm1, %v1038_v0 }
 0x2cd   :  { %927 = vmatprep.subr.bf16.mxu1 %v1038_v0 }
 0x2d0   :  { %928 = vmatpush3.bf16.msra.mxu1 %v1089_v2 }
 0x2d1   :  { %941 = vmatprep.subr.bf16.mxu1 %v1038_v0 }
 0x39e   :  { %v186_v31 = vpop.f32.mrb[0].mxu1 }
 0x39f   :  { %v192_v32 = vadd.f32 %v186_v31, %v146_v30  ;;  %v915_v33 = vpop.f32.mrb[1].mxu1 }
 0x3a0   :  { %v189_v34 = vpop.f32.mrb[2].mxu1 }
 0x3a1   :  { %982 = vtanh.f32 %v192_v32  ;;  %v916_v35 = vpop.f32.mrb[3].mxu1  ;;  %v851_v37 = vmul.f32 -1.442695, %v192_v32 }
 0x3a2   :  { %v861_v35 = vld [vmem:[%s1272_s0 + $0x4] sm:$0x1] }
 0x3a3   :  { %984 = vpow2.f32 %v851_v37 }
 0x3ab   :  { %v983_v36 = vpop.eup %982 }
 0x3ac   :  { %202 = vrot.lane.b32.xlu1 %v983_v36, %s1040_s20  ;;  %v428_v36 = vunpack.c.l.bf16 %v861_v35 }
 0x3ad   :  { %v985_v38 = vpop.eup %984 }
 0x3ae   :  { %v196_v39 = vadd.f32 1.0, %v985_v38 }
 0x3b0   :  { %986 = vrcp.f32 %v196_v39 }
 0x3ba   :  { %v987_v40 = vpop.eup %986 }
 0x3bb   :  { %v200_v43 = vmul.f32 %v987_v40, %v116_v23 }
 0x41e   :  { %v203_v41 = vpop.permute.xlu1 %202 }
 0x41f   :  { %v205_v42 = vmul.f32 %v987_v40, %v203_v41 }
 0x421   :  { %207 = vrot.lane.b32.xlu0 %v205_v42, %s1041_s21 }
 0x493   :  { %v208_v44 = vpop.permute.xlu0 %207 }
 0x494   :  { %v210_v45 = vadd.f32 %v208_v44, %v200_v43 }
 0x496   :  { %988 = vtanh.f32 %v210_v45 }
 0x4a0   :  { %v989_v46 = vpop.eup %988 }
 0x4a1   :  { %213 = vrot.lane.b32.xlu1 %v989_v46, %s1040_s20 }
 0x513   :  { %v214_v47 = vpop.permute.xlu1 %213 }
 0x514   :  { %v216_v48 = vmul.f32 %v987_v40, %v214_v47 }
 0x516   :  { %v1129_v49 = vpack.c.bf16 %v216_v48, %v216_v48 }
 0x518   :  { %241 = vrot.lane.b32.xlu0 %v1129_v49, %s1041_s21 }
 0x58a   :  { %v242_v50 = vpop.permute.xlu0 %241 }
 0x58b   :  { %922 = vmatmul.mubr.msk.bf16.vlgmr.msra.gmra.mrb[4].mxu0 %vm43_vm2, %v242_v50 }
 0x58c   :  { %934 = vmatpush3.bf16.msra.mxu0 %v1074_v1  ;;  %937 = vmatprep.mubr.msk.bf16.mxu0 %vm1039_vm1, %v1038_v0 }
 0x58d   :  { %935 = vmatprep.subr.bf16.mxu0 %v1038_v0 }
 0x590   :  { %936 = vmatpush3.bf16.msra.mxu0 %v1089_v2 }
 0x591   :  { %949 = vmatprep.subr.bf16.mxu0 %v1038_v0 }
 0x65e   :  { %v280_v53 = vpop.f32.mrb[4].mxu0 }
 0x65f   :  { %v286_v54 = vadd.f32 %v280_v53, %v240_v52  ;;  %v923_v55 = vpop.f32.mrb[5].mxu0 }
 0x660   :  { %v283_v56 = vpop.f32.mrb[6].mxu0 }
 0x661   :  { %990 = vtanh.f32 %v286_v54  ;;  %v924_v57 = vpop.f32.mrb[7].mxu0  ;;  %v855_v59 = vmul.f32 -1.442695, %v286_v54 }
 0x663   :  { %992 = vpow2.f32 %v855_v59 }
 0x66b   :  { %v991_v58 = vpop.eup %990 }
 0x66c   :  { %296 = vrot.lane.b32.xlu1 %v991_v58, %s1040_s20  ;;  %v865_v58 = vld [vmem:[%s1272_s0 + $0x5] sm:$0x1] }
 0x66d   :  { %v993_v60 = vpop.eup %992  ;;  %v522_v59 = vunpack.c.l.bf16 %v865_v58 }
 0x66e   :  { %v290_v61 = vadd.f32 1.0, %v993_v60 }
 0x670   :  { %994 = vrcp.f32 %v290_v61 }
 0x67a   :  { %v995_v62 = vpop.eup %994 }
 0x67b   :  { %v294_v4 = vmul.f32 %v995_v62, %v210_v45 }
 0x6de   :  { %v297_v63 = vpop.permute.xlu1 %296 }
 0x6df   :  { %v299_v3 = vmul.f32 %v995_v62, %v297_v63 }
 0x6e1   :  { %301 = vrot.lane.b32.xlu0 %v299_v3, %s1041_s21 }
 0x753   :  { %v302_v5 = vpop.permute.xlu0 %301 }
 0x754   :  { %v304_v6 = vadd.f32 %v302_v5, %v294_v4 }
 0x756   :  { %996 = vtanh.f32 %v304_v6 }
 0x760   :  { %v997_v7 = vpop.eup %996 }
 0x761   :  { %307 = vrot.lane.b32.xlu1 %v997_v7, %s1040_s20 }
 0x7d3   :  { %v308_v8 = vpop.permute.xlu1 %307 }
 0x7d4   :  { %v310_v9 = vmul.f32 %v995_v62, %v308_v8 }
 0x7d6   :  { %v1146_v10 = vpack.c.bf16 %v310_v9, %v310_v9 }
 0x7d8   :  { %335 = vrot.lane.b32.xlu0 %v1146_v10, %s1041_s21 }
 0x84a   :  { %v336_v11 = vpop.permute.xlu0 %335 }
 0x84b   :  { %930 = vmatmul.mubr.msk.bf16.vlgmr.msra.gmra.mrb[4].mxu1 %vm43_vm2, %v336_v11 }
 0x84c   :  { %942 = vmatpush3.bf16.msra.mxu1 %v1074_v1  ;;  %945 = vmatprep.mubr.msk.bf16.mxu1 %vm1039_vm1, %v1038_v0 }
 0x84d   :  { %943 = vmatprep.subr.bf16.mxu1 %v1038_v0 }
 0x850   :  { %944 = vmatpush3.bf16.msra.mxu1 %v1089_v2 }
 0x851   :  { %957 = vmatprep.subr.bf16.mxu1 %v1038_v0 }
 0x91e   :  { %v374_v14 = vpop.f32.mrb[4].mxu1 }
 0x91f   :  { %v380_v15 = vadd.f32 %v374_v14, %v334_v13  ;;  %v931_v16 = vpop.f32.mrb[5].mxu1 }
 0x920   :  { %v377_v17 = vpop.f32.mrb[6].mxu1 }
 0x921   :  { %998 = vtanh.f32 %v380_v15  ;;  %v932_v18 = vpop.f32.mrb[7].mxu1  ;;  %v859_v20 = vmul.f32 -1.442695, %v380_v15  ;;  %v869_v17 = vld [vmem:[%s1272_s0 + $0x6] sm:$0x1] }
 0x922   :  { %v616_v18 = vunpack.c.l.bf16 %v869_v17 }
 0x923   :  { %1000 = vpow2.f32 %v859_v20 }
 0x92b   :  { %v999_v19 = vpop.eup %998 }
 0x92c   :  { %390 = vrot.lane.b32.xlu1 %v999_v19, %s1040_s20 }
 0x92d   :  { %v1001_v21 = vpop.eup %1000 }
 0x92e   :  { %v384_v22 = vadd.f32 1.0, %v1001_v21 }
 0x930   :  { %1002 = vrcp.f32 %v384_v22 }
 0x93a   :  { %v1003_v23 = vpop.eup %1002 }
 0x93b   :  { %v388_v26 = vmul.f32 %v1003_v23, %v304_v6 }
 0x99e   :  { %v391_v24 = vpop.permute.xlu1 %390 }
 0x99f   :  { %v393_v25 = vmul.f32 %v1003_v23, %v391_v24 }
 0x9a1   :  { %395 = vrot.lane.b32.xlu0 %v393_v25, %s1041_s21 }
 0xa13   :  { %v396_v28 = vpop.permute.xlu0 %395 }
 0xa14   :  { %v398_v29 = vadd.f32 %v396_v28, %v388_v26 }
 0xa16   :  { %1004 = vtanh.f32 %v398_v29 }
 0xa20   :  { %v1005_v30 = vpop.eup %1004 }
 0xa21   :  { %401 = vrot.lane.b32.xlu1 %v1005_v30, %s1040_s20 }
 0xa93   :  { %v402_v31 = vpop.permute.xlu1 %401 }
 0xa94   :  { %v404_v32 = vmul.f32 %v1003_v23, %v402_v31 }
 0xa96   :  { %v1163_v33 = vpack.c.bf16 %v404_v32, %v404_v32 }
 0xa98   :  { %429 = vrot.lane.b32.xlu0 %v1163_v33, %s1041_s21 }
 0xb0a   :  { %v430_v34 = vpop.permute.xlu0 %429 }
 0xb0b   :  { %938 = vmatmul.mubr.msk.bf16.vlgmr.msra.gmra.mrb[8].mxu0 %vm43_vm2, %v430_v34 }
 0xb0c   :  { %950 = vmatpush3.bf16.msra.mxu0 %v1074_v1  ;;  %953 = vmatprep.mubr.msk.bf16.mxu0 %vm1039_vm1, %v1038_v0 }
 0xb0d   :  { %951 = vmatprep.subr.bf16.mxu0 %v1038_v0 }
 0xb10   :  { %952 = vmatpush3.bf16.msra.mxu0 %v1089_v2 }
 0xbde   :  { %v468_v37 = vpop.f32.mrb[8].mxu0 }
 0xbdf   :  { %v474_v38 = vadd.f32 %v468_v37, %v428_v36  ;;  %v939_v39 = vpop.f32.mrb[9].mxu0 }
 0xbe0   :  { %v471_v40 = vpop.f32.mrb[10].mxu0 }
 0xbe1   :  { %1006 = vtanh.f32 %v474_v38  ;;  %v940_v41 = vpop.f32.mrb[11].mxu0  ;;  %v863_v43 = vmul.f32 -1.442695, %v474_v38 }
 0xbe2   :  { %v873_v41 = vld [vmem:[%s1272_s0 + $0x7] sm:$0x1] }
 0xbe3   :  { %1008 = vpow2.f32 %v863_v43 }
 0xbeb   :  { %v1007_v42 = vpop.eup %1006 }
 0xbec   :  { %484 = vrot.lane.b32.xlu1 %v1007_v42, %s1040_s20  ;;  %v710_v42 = vunpack.c.l.bf16 %v873_v41 }
 0xbed   :  { %v1009_v44 = vpop.eup %1008 }
 0xbee   :  { %v478_v45 = vadd.f32 1.0, %v1009_v44 }
 0xbf0   :  { %1010 = vrcp.f32 %v478_v45 }
 0xbfa   :  { %v1011_v46 = vpop.eup %1010 }
 0xbfb   :  { %v482_v50 = vmul.f32 %v1011_v46, %v398_v29 }
 0xc5e   :  { %v485_v47 = vpop.permute.xlu1 %484 }
 0xc5f   :  { %v487_v48 = vmul.f32 %v1011_v46, %v485_v47 }
 0xc61   :  { %489 = vrot.lane.b32.xlu0 %v487_v48, %s1041_s21 }
 0xcd3   :  { %v490_v51 = vpop.permute.xlu0 %489 }
 0xcd4   :  { %v492_v52 = vadd.f32 %v490_v51, %v482_v50 }
 0xcd6   :  { %1012 = vtanh.f32 %v492_v52 }
 0xce0   :  { %v1013_v53 = vpop.eup %1012 }
 0xce1   :  { %495 = vrot.lane.b32.xlu1 %v1013_v53, %s1040_s20  ;;  %v1042_v53 = vmov 1966171168  }
 0xd53   :  { %v496_v54 = vpop.permute.xlu1 %495 }
 0xd54   :  { %v498_v55 = vmul.f32 %v1011_v46, %v496_v54  ;;  %v126_v54 = vunpack.c.l.s4 %v1042_v53 }
 0xd56   :  { %v1179_v56 = vpack.c.bf16 %v498_v55, %v498_v55  ;;  %v128_v55 = vlaneseq }
 0xd58   :  { %523 = vrot.lane.b32.xlu0 %v1179_v56, %s1041_s21  ;;  %v129_v58 = vshrl.u32 %v128_v55, 7 }
 0xdca   :  { %v524_v57 = vpop.permute.xlu0 %523 }
 0xdcb   :  { %946 = vmatmul.mubr.msk.bf16.vlgmr.msra.gmra.mrb[8].mxu1 %vm43_vm2, %v524_v57  ;;  %v127_v57 = vunpack.c.0.s8 %v126_v54 }
 0xdcc   :  { %958 = vmatpush3.bf16.msra.mxu1 %v1074_v1  ;;  %961 = vmatprep.mubr.msk.bf16.mxu1 %vm1039_vm1, %v1038_v0 }
 0xdcd   :  { %959 = vmatprep.subr.bf16.mxu1 %v1038_v0 }
 0xdd0   :  { %960 = vmatpush3.bf16.msra.mxu1 %v1089_v2 }
 0xe9e   :  { %v562_v60 = vpop.f32.mrb[8].mxu1 }
 0xe9f   :  { %v568_v61 = vadd.f32 %v562_v60, %v522_v59  ;;  %v947_v62 = vpop.f32.mrb[9].mxu1  ;;  %v130_v59 = vsub.s32 %v127_v57, %v129_v58 }
 0xea0   :  { %v565_v63 = vpop.f32.mrb[10].mxu1 }
 0xea1   :  { %1014 = vtanh.f32 %v568_v61  ;;  %v948_v3 = vpop.f32.mrb[11].mxu1  ;;  %v867_v1 = vmul.f32 -1.442695, %v568_v61  ;;  %v131_v62 = vrot.slane %v1112_v27, %v130_v59 }
 0xea2   :  { %v319_v3 = vrot.slane %v1146_v10, %v130_v59 }
 0xea3   :  { %1016 = vpow2.f32 %v867_v1  ;;  %v507_v1 = vrot.slane %v1179_v56, %v130_v59 }
 0xeab   :  { %v1015_v4 = vpop.eup %1014 }
 0xeac   :  { %578 = vrot.lane.b32.xlu1 %v1015_v4, %s1040_s20  ;;  %v138_v4 = vrot.slane %v131_v62, %v130_v59 }
 0xead   :  { %v1017_v5 = vpop.eup %1016 }
 0xeae   :  { %v572_v0 = vadd.f32 1.0, %v1017_v5  ;;  %v326_v5 = vrot.slane %v319_v3, %v130_v59 }
 0xeb0   :  { %1018 = vrcp.f32 %v572_v0 }
 0xeba   :  { %v1019_v2 = vpop.eup %1018 }
 0xebb   :  { %v576_v8 = vmul.f32 %v1019_v2, %v492_v52 }
 0xf1e   :  { %v579_v6 = vpop.permute.xlu1 %578 }
 0xf1f   :  { %v581_v7 = vmul.f32 %v1019_v2, %v579_v6 }
 0xf21   :  { %583 = vrot.lane.b32.xlu0 %v581_v7, %s1041_s21 }
 0xf93   :  { %v584_v9 = vpop.permute.xlu0 %583 }
 0xf94   :  { %v586_v11 = vadd.f32 %v584_v9, %v576_v8  ;;  %v225_v9 = vrot.slane %v1129_v49, %v130_v59 }
 0xf96   :  { %1020 = vtanh.f32 %v586_v11 }
 0xfa0   :  { %v1021_v12 = vpop.eup %1020 }
 0xfa1   :  { %589 = vrot.lane.b32.xlu1 %v1021_v12, %s1040_s20 }
0x1013   :  { %v590_v13 = vpop.permute.xlu1 %589 }
0x1014   :  { %v592_v14 = vmul.f32 %v1019_v2, %v590_v13  ;;  %v514_v2 = vrot.slane %v507_v1, %v130_v59  ;;  %v413_v13 = vrot.slane %v1163_v33, %v130_v59 }
0x1016   :  { %v1195_v15 = vpack.c.bf16 %v592_v14, %v592_v14  ;;  %v420_v17 = vrot.slane %v413_v13, %v130_v59 }
0x1018   :  { %617 = vrot.lane.b32.xlu0 %v1195_v15, %s1041_s21  ;;  %v601_v49 = vrot.slane %v1195_v15, %v130_v59 }
0x108a   :  { %v618_v16 = vpop.permute.xlu0 %617 }
0x108b   :  { %954 = vmatmul.mubr.msk.bf16.vlgmr.msra.gmra.mrb[12].mxu0 %vm43_vm2, %v618_v16  ;;  %v232_v16 = vrot.slane %v225_v9, %v130_v59 }
0x115e   :  { %v656_v19 = vpop.f32.mrb[12].mxu0 }
0x115f   :  { %v662_v20 = vadd.f32 %v656_v19, %v616_v18  ;;  %v955_v21 = vpop.f32.mrb[13].mxu0  ;;  %v608_v18 = vrot.slane %v601_v49, %v130_v59  ;;  %v1043_v19 = vmov 1983009808  }
0x1160   :  { %v659_v22 = vpop.f32.mrb[14].mxu0 }
0x1161   :  { %1022 = vtanh.f32 %v662_v20  ;;  %v956_v23 = vpop.f32.mrb[15].mxu0  ;;  %v871_v25 = vmul.f32 -1.442695, %v662_v20  ;;  %v804_v20 = vunpack.c.l.s4 %v1043_v19 }
0x1163   :  { %1024 = vpow2.f32 %v871_v25  ;;  %v805_v33 = vunpack.c.0.s8 %v804_v20 }
0x1165   :  { %v808_v22 = vsub.s32 %v805_v33, %v129_v58 }
0x116b   :  { %v1023_v24 = vpop.eup %1022 }
0x116c   :  { %672 = vrot.lane.b32.xlu1 %v1023_v24, %s1040_s20 }
0x116d   :  { %v1025_v26 = vpop.eup %1024 }
0x116e   :  { %v666_v28 = vadd.f32 1.0, %v1025_v26 }
0x1170   :  { %1026 = vrcp.f32 %v666_v28 }
0x117a   :  { %v1027_v29 = vpop.eup %1026 }
0x117b   :  { %v670_v32 = vmul.f32 %v1027_v29, %v586_v11 }
0x11de   :  { %v673_v30 = vpop.permute.xlu1 %672 }
0x11df   :  { %v675_v31 = vmul.f32 %v1027_v29, %v673_v30 }
0x11e1   :  { %677 = vrot.lane.b32.xlu0 %v675_v31, %s1041_s21 }
0x1253   :  { %v678_v34 = vpop.permute.xlu0 %677 }
0x1254   :  { %v680_v35 = vadd.f32 %v678_v34, %v670_v32 }
0x1256   :  { %1028 = vtanh.f32 %v680_v35 }
0x1260   :  { %v1029_v36 = vpop.eup %1028 }
0x1261   :  { %683 = vrot.lane.b32.xlu1 %v1029_v36, %s1040_s20 }
0x12d3   :  { %v684_v37 = vpop.permute.xlu1 %683 }
0x12d4   :  { %v686_v38 = vmul.f32 %v1027_v29, %v684_v37 }
0x12d6   :  { %v687_v39 = vpack.c.bf16 %v686_v38, %v686_v38 }
0x12d8   :  { %711 = vrot.lane.b32.xlu0 %v687_v39, %s1041_s21  ;;  %v695_v0 = vrot.slane %v687_v39, %v130_v59 }
0x12da   :  { %v702_v6 = vrot.slane %v695_v0, %v130_v59 }
0x134a   :  { %v712_v40 = vpop.permute.xlu0 %711 }
0x134b   :  { %962 = vmatmul.mubr.msk.bf16.vlgmr.msra.gmra.mrb[12].mxu1 %vm43_vm2, %v712_v40 }
0x141e   :  { %v750_v43 = vpop.f32.mrb[12].mxu1 }
0x141f   :  { %v756_v44 = vadd.f32 %v750_v43, %v710_v42  ;;  %v963_v45 = vpop.f32.mrb[13].mxu1 }
0x1420   :  { %v753_v46 = vpop.f32.mrb[14].mxu1 }
0x1421   :  { %1030 = vtanh.f32 %v756_v44  ;;  %v964_v47 = vpop.f32.mrb[15].mxu1  ;;  %v875_v50 = vmul.f32 -1.442695, %v756_v44 }
0x1423   :  { %1032 = vpow2.f32 %v875_v50 }
0x142b   :  { %v1031_v48 = vpop.eup %1030 }
0x142c   :  { %766 = vrot.lane.b32.xlu1 %v1031_v48, %s1040_s20 }
0x142d   :  { %v1033_v51 = vpop.eup %1032 }
0x142e   :  { %v760_v52 = vadd.f32 1.0, %v1033_v51 }
0x1430   :  { %1034 = vrcp.f32 %v760_v52 }
0x143a   :  { %v1035_v60 = vpop.eup %1034 }
0x143b   :  { %v764_v27 = vmul.f32 %v1035_v60, %v680_v35 }
0x149e   :  { %v767_v61 = vpop.permute.xlu1 %766 }
0x149f   :  { %v769_v63 = vmul.f32 %v1035_v60, %v767_v61 }
0x14a1   :  { %771 = vrot.lane.b32.xlu0 %v769_v63, %s1041_s21 }
0x14a5   :  { %139 = vrot.lane.b32.xlu0 %v138_v4, %s1041_s21 }
0x14a9   :  { %327 = vrot.lane.b32.xlu0 %v326_v5, %s1041_s21 }
0x14ad   :  { %515 = vrot.lane.b32.xlu0 %v514_v2, %s1041_s21 }
0x14b1   :  { %703 = vrot.lane.b32.xlu0 %v702_v6, %s1041_s21 }
0x1513   :  { %v772_v7 = vpop.permute.xlu0 %771 }
0x1514   :  { %v774_v8 = vadd.f32 %v772_v7, %v764_v27 }
0x1516   :  { %1036 = vtanh.f32 %v774_v8  ;;  %v822_v30 = vrot.slane %v774_v8, %v808_v22 }
0x1517   :  { %v140_v10 = vpop.permute.xlu0 %139 }
0x1518   :  { %143 = vst.msk [vmem:[%s1273_s2] sm:$0x1] %vm142_vm3, %v140_v10 }
0x151b   :  { %v328_v56 = vpop.permute.xlu0 %327 }
0x151c   :  { %856 = vst.msk [vmem:[%s1273_s2 + $0x2] sm:$0x1] %vm142_vm3, %v328_v56 }
0x151f   :  { %v516_v11 = vpop.permute.xlu0 %515 }
0x1520   :  { %v1037_v12 = vpop.eup %1036  ;;  %864 = vst.msk [vmem:[%s1273_s2 + $0x4] sm:$0x1] %vm142_vm3, %v516_v11 }
0x1521   :  { %777 = vrot.lane.b32.xlu1 %v1037_v12, %s1040_s20 }
0x1523   :  { %v704_v14 = vpop.permute.xlu0 %703 }
0x1524   :  { %872 = vst.msk [vmem:[%s1273_s2 + $0x6] sm:$0x1] %vm142_vm3, %v704_v14 }
0x1525   :  { %233 = vrot.lane.b32.xlu1 %v232_v16, %s1041_s21 }
0x1529   :  { %421 = vrot.lane.b32.xlu1 %v420_v17, %s1041_s21 }
0x152d   :  { %609 = vrot.lane.b32.xlu1 %v608_v18, %s1041_s21 }
0x1593   :  { %v778_v21 = vpop.permute.xlu1 %777 }
0x1594   :  { %v780_v23 = vmul.f32 %v1035_v60, %v778_v21 }
0x1596   :  { %v781_v24 = vpack.c.bf16 %v780_v23, %v780_v23  ;;  %v809_v25 = vrot.slane %v780_v23, %v808_v22 }
0x1597   :  { %v234_v26 = vpop.permute.xlu1 %233 }
0x1598   :  { %v789_v28 = vrot.slane %v781_v24, %v130_v59  ;;  %852 = vst.msk [vmem:[%s1273_s2 + $0x1] sm:$0x1] %vm142_vm3, %v234_v26  ;;  %810 = vrot.lane.b32.xlu0 %v809_v25, %s1041_s21 }
0x159a   :  { %v796_v15 = vrot.slane %v789_v28, %v130_v59 }
0x159b   :  { %v422_v29 = vpop.permute.xlu1 %421 }
0x159c   :  { %860 = vst.msk [vmem:[%s1273_s2 + $0x3] sm:$0x1] %vm142_vm3, %v422_v29  ;;  %797 = vrot.lane.b32.xlu1 %v796_v15, %s1041_s21 }
0x159f   :  { %v610_v31 = vpop.permute.xlu1 %609 }
0x15a0   :  { %868 = vst.msk [vmem:[%s1273_s2 + $0x5] sm:$0x1] %vm142_vm3, %v610_v31  ;;  %823 = vrot.lane.b32.xlu1 %v822_v30, %s1044_s23 }
0x160a   :  { %v811_v32 = vpop.permute.xlu0 %810 }
0x160b   :  { %814 = vst.msk [vmem:[#allocation2] sm:$0x3] %vm19_vm0, %v811_v32  ;;  %830 = vst.msk [vmem:[%s1274_s3] sm:$0x3] %vm19_vm0, %v811_v32 }
0x160e   :  { %v798_v34 = vpop.permute.xlu1 %797 }
0x160f   :  { %876 = vst.msk [vmem:[%s1273_s2 + $0x7] sm:$0x1] %vm142_vm3, %v798_v34 }
0x1612   :  { %v824_v35 = vpop.permute.xlu1 %823 }
0x1613   :  { %826 = vst.msk [vmem:[#allocation3] sm:$0x3] %vm19_vm0, %v824_v35  ;;  %831 = vst.msk [vmem:[%s1275_s4] sm:$0x3] %vm19_vm0, %v824_v35 }

// kernel: lstm_weight_drop_forward.3
= control target key start
LH: loop header
LB: loop body
LE: loop exit
PB: predicated region body
PF: predicated region fallthrough
CT: control target
= control target key end

     0   :  { %vm19_vm0 = vcmask 254976   ;;  %v975_v0 = vmov 0.0   ;;  %vm976_vm1 = vmmov 0   ;;  %vm43_vm2 = vcmask 261120   ;;  %s977_s20 = smov 64   ;;  %s978_s21 = smov 32   ;;  %s1212_s1 = inlined_call_operand.vmem [shape: bf16[32,128], index: 1, kind: input, shape index: {}]   ;;  %s1213_s0 = inlined_call_operand.vmem [shape: bf16[8,2,128], index: 0, kind: input, shape index: {}]   ;;  %s1214_s2 = inlined_call_operand.vmem [shape: f32[8,2,32], index: 2, kind: output, shape index: {0}]   ;;  %s1215_s4 = inlined_call_operand.vmem [shape: f32[2,32], index: 4, kind: output, shape index: {2}]   ;;  %s1216_s3 = inlined_call_operand.vmem [shape: f32[2,32], index: 3, kind: output, shape index: {1}]  }
   0x1   :  { %839 = vmatprep.subr.bf16.mxu0 %v975_v0  ;;  %v1010_v1 = vld [vmem:[%s1212_s1] sm:$0xff]   ;;  %843 = vmatprep.mubr.msk.bf16.mxu0 %vm976_vm1, %v975_v0  ;;  %20 = vst.msk [vmem:[#allocation2] sm:$0x3] %vm19_vm0, %v975_v0  ;;  %21 = vst.msk [vmem:[#allocation3] sm:$0x3] %vm19_vm0, %v975_v0  ;;  %v1025_v2 = vld [vmem:[%s1212_s1 + $0x8] sm:$0xff]  }
   0x2   :  { %847 = vmatprep.subr.bf16.mxu1 %v975_v0  ;;  %851 = vmatprep.mubr.msk.bf16.mxu1 %vm976_vm1, %v975_v0  ;;  %v28_v5 = vld [vmem:[%s1213_s0] sm:$0x1]  ;;  %v787_v29 = vld [vmem:[%s1213_s0 + $0x1] sm:$0x1]  ;;  %v791_v51 = vld [vmem:[%s1213_s0 + $0x2] sm:$0x1] }
   0x3   :  { %840 = vmatpush3.bf16.msra.mxu0 %v1010_v1  ;;  %848 = vmatpush3.bf16.msra.mxu1 %v1010_v1  ;;  %v29_v6 = vunpack.c.l.bf16 %v28_v5  ;;  %v138_v30 = vunpack.c.l.bf16 %v787_v29  ;;  %v226_v52 = vunpack.c.l.bf16 %v791_v51  ;;  %s980_s11 = smov 96  }
   0x4   :  { %841 = vmatprep.subr.bf16.mxu0 %v975_v0  ;;  %849 = vmatprep.subr.bf16.mxu1 %v975_v0 }
   0x7   :  { %842 = vmatpush3.bf16.msra.mxu0 %v1025_v2  ;;  %850 = vmatpush3.bf16.msra.mxu1 %v1025_v2 }
   0x8   :  { %v26_v3 = vld [vmem:[#allocation2] sm:$0x3]  ;;  %855 = vmatprep.subr.bf16.mxu0 %v975_v0  ;;  %863 = vmatprep.subr.bf16.mxu1 %v975_v0  ;;  %v786_v13 = vld.sshfl [vmem:[#allocation3] sm:$0x3 pattern:$0x76325410] }
   0x9   :  { %v30_v4 = vpack.c.bf16 %v26_v3, %v26_v3 }
   0xb   :  { %844 = vmatmul.mubr.msk.bf16.vlgmr.msra.gmra.mrb[0].mxu0 %vm43_vm2, %v30_v4 }
   0xc   :  { %856 = vmatpush3.bf16.msra.mxu0 %v1010_v1  ;;  %859 = vmatprep.mubr.msk.bf16.mxu0 %vm976_vm1, %v975_v0 }
   0xd   :  { %857 = vmatprep.subr.bf16.mxu0 %v975_v0 }
  0x10   :  { %858 = vmatpush3.bf16.msra.mxu0 %v1025_v2 }
  0x11   :  { %871 = vmatprep.subr.bf16.mxu0 %v975_v0 }
  0xde   :  { %v81_v7 = vpop.f32.mrb[0].mxu0 }
  0xdf   :  { %v87_v8 = vadd.f32 %v81_v7, %v29_v6  ;;  %v845_v9 = vpop.f32.mrb[1].mxu0 }
  0xe0   :  { %v84_v10 = vpop.f32.mrb[2].mxu0 }
  0xe1   :  { %911 = vtanh.f32 %v87_v8  ;;  %v846_v11 = vpop.f32.mrb[3].mxu0  ;;  %v785_v14 = vmul.f32 -1.442695, %v87_v8 }
  0xe3   :  { %913 = vpow2.f32 %v785_v14 }
  0xeb   :  { %v912_v12 = vpop.eup %911 }
  0xec   :  { %108 = vrot.lane.b32.xlu0 %v912_v12, %s977_s20  ;;  %v795_v12 = vld [vmem:[%s1213_s0 + $0x3] sm:$0x1] }
  0xed   :  { %v914_v15 = vpop.eup %913 }
  0xee   :  { %v91_v16 = vadd.f32 1.0, %v914_v15 }
  0xf0   :  { %103 = vrot.lane.b32.xlu0 %v786_v13, %s978_s21  ;;  %915 = vrcp.f32 %v91_v16  ;;  %v314_v13 = vunpack.c.l.bf16 %v795_v12 }
  0xfa   :  { %v916_v17 = vpop.eup %915 }
 0x15e   :  { %v109_v18 = vpop.permute.xlu0 %108 }
 0x15f   :  { %v111_v19 = vmul.f32 %v916_v17, %v109_v18 }
 0x161   :  { %113 = vrot.lane.b32.xlu1 %v111_v19, %s978_s21 }
 0x162   :  { %v104_v20 = vpop.permute.xlu0 %103 }
 0x163   :  { %v106_v21 = vmul.f32 %v916_v17, %v104_v20 }
 0x1d3   :  { %v114_v22 = vpop.permute.xlu1 %113 }
 0x1d4   :  { %v116_v23 = vadd.f32 %v114_v22, %v106_v21 }
 0x1d6   :  { %917 = vtanh.f32 %v116_v23 }
 0x1e0   :  { %v918_v24 = vpop.eup %917 }
 0x1e1   :  { %119 = vrot.lane.b32.xlu1 %v918_v24, %s977_s20 }
 0x253   :  { %v120_v25 = vpop.permute.xlu1 %119 }
 0x254   :  { %v1048_v26 = vmul.f32 %v916_v17, %v120_v25 }
 0x256   :  { %v139_v27 = vpack.c.bf16 %v1048_v26, %v1048_v26 }
 0x258   :  { %141 = vrot.lane.b32.xlu0 %v139_v27, %s978_s21 }
 0x2ca   :  { %v142_v28 = vpop.permute.xlu0 %141 }
 0x2cb   :  { %852 = vmatmul.mubr.msk.bf16.vlgmr.msra.gmra.mrb[0].mxu1 %vm43_vm2, %v142_v28 }
 0x2cc   :  { %864 = vmatpush3.bf16.msra.mxu1 %v1010_v1  ;;  %867 = vmatprep.mubr.msk.bf16.mxu1 %vm976_vm1, %v975_v0 }
 0x2cd   :  { %865 = vmatprep.subr.bf16.mxu1 %v975_v0 }
 0x2d0   :  { %866 = vmatpush3.bf16.msra.mxu1 %v1025_v2 }
 0x2d1   :  { %879 = vmatprep.subr.bf16.mxu1 %v975_v0 }
 0x39e   :  { %v180_v31 = vpop.f32.mrb[0].mxu1 }
 0x39f   :  { %v186_v32 = vadd.f32 %v180_v31, %v138_v30  ;;  %v853_v33 = vpop.f32.mrb[1].mxu1 }
 0x3a0   :  { %v183_v34 = vpop.f32.mrb[2].mxu1 }
 0x3a1   :  { %919 = vtanh.f32 %v186_v32  ;;  %v854_v35 = vpop.f32.mrb[3].mxu1  ;;  %v789_v37 = vmul.f32 -1.442695, %v186_v32 }
 0x3a2   :  { %v799_v35 = vld [vmem:[%s1213_s0 + $0x4] sm:$0x1] }
 0x3a3   :  { %921 = vpow2.f32 %v789_v37 }
 0x3ab   :  { %v920_v36 = vpop.eup %919 }
 0x3ac   :  { %196 = vrot.lane.b32.xlu1 %v920_v36, %s977_s20  ;;  %v402_v36 = vunpack.c.l.bf16 %v799_v35 }
 0x3ad   :  { %v922_v38 = vpop.eup %921 }
 0x3ae   :  { %v190_v39 = vadd.f32 1.0, %v922_v38 }
 0x3b0   :  { %923 = vrcp.f32 %v190_v39 }
 0x3ba   :  { %v924_v40 = vpop.eup %923 }
 0x3bb   :  { %v194_v43 = vmul.f32 %v924_v40, %v116_v23 }
 0x41e   :  { %v197_v41 = vpop.permute.xlu1 %196 }
 0x41f   :  { %v199_v42 = vmul.f32 %v924_v40, %v197_v41 }
 0x421   :  { %201 = vrot.lane.b32.xlu0 %v199_v42, %s978_s21 }
 0x493   :  { %v202_v44 = vpop.permute.xlu0 %201 }
 0x494   :  { %v204_v45 = vadd.f32 %v202_v44, %v194_v43 }
 0x496   :  { %925 = vtanh.f32 %v204_v45 }
 0x4a0   :  { %v926_v46 = vpop.eup %925 }
 0x4a1   :  { %207 = vrot.lane.b32.xlu1 %v926_v46, %s977_s20 }
 0x513   :  { %v208_v47 = vpop.permute.xlu1 %207 }
 0x514   :  { %v1066_v48 = vmul.f32 %v924_v40, %v208_v47 }
 0x516   :  { %v227_v49 = vpack.c.bf16 %v1066_v48, %v1066_v48 }
 0x518   :  { %229 = vrot.lane.b32.xlu0 %v227_v49, %s978_s21 }
 0x58a   :  { %v230_v50 = vpop.permute.xlu0 %229 }
 0x58b   :  { %860 = vmatmul.mubr.msk.bf16.vlgmr.msra.gmra.mrb[4].mxu0 %vm43_vm2, %v230_v50 }
 0x58c   :  { %872 = vmatpush3.bf16.msra.mxu0 %v1010_v1  ;;  %875 = vmatprep.mubr.msk.bf16.mxu0 %vm976_vm1, %v975_v0 }
 0x58d   :  { %873 = vmatprep.subr.bf16.mxu0 %v975_v0 }
 0x590   :  { %874 = vmatpush3.bf16.msra.mxu0 %v1025_v2 }
 0x591   :  { %887 = vmatprep.subr.bf16.mxu0 %v975_v0 }
 0x65e   :  { %v268_v53 = vpop.f32.mrb[4].mxu0 }
 0x65f   :  { %v274_v54 = vadd.f32 %v268_v53, %v226_v52  ;;  %v861_v55 = vpop.f32.mrb[5].mxu0 }
 0x660   :  { %v271_v56 = vpop.f32.mrb[6].mxu0 }
 0x661   :  { %927 = vtanh.f32 %v274_v54  ;;  %v862_v57 = vpop.f32.mrb[7].mxu0  ;;  %v793_v59 = vmul.f32 -1.442695, %v274_v54 }
 0x663   :  { %929 = vpow2.f32 %v793_v59 }
 0x66b   :  { %v928_v58 = vpop.eup %927 }
 0x66c   :  { %284 = vrot.lane.b32.xlu1 %v928_v58, %s977_s20  ;;  %v803_v58 = vld [vmem:[%s1213_s0 + $0x5] sm:$0x1] }
 0x66d   :  { %v930_v60 = vpop.eup %929  ;;  %v490_v59 = vunpack.c.l.bf16 %v803_v58 }
 0x66e   :  { %v278_v61 = vadd.f32 1.0, %v930_v60 }
 0x670   :  { %931 = vrcp.f32 %v278_v61 }
 0x67a   :  { %v932_v62 = vpop.eup %931 }
 0x67b   :  { %v282_v4 = vmul.f32 %v932_v62, %v204_v45 }
 0x6de   :  { %v285_v63 = vpop.permute.xlu1 %284 }
 0x6df   :  { %v287_v3 = vmul.f32 %v932_v62, %v285_v63 }
 0x6e1   :  { %289 = vrot.lane.b32.xlu0 %v287_v3, %s978_s21 }
 0x753   :  { %v290_v5 = vpop.permute.xlu0 %289 }
 0x754   :  { %v292_v6 = vadd.f32 %v290_v5, %v282_v4 }
 0x756   :  { %933 = vtanh.f32 %v292_v6 }
 0x760   :  { %v934_v7 = vpop.eup %933 }
 0x761   :  { %295 = vrot.lane.b32.xlu1 %v934_v7, %s977_s20 }
 0x7d3   :  { %v296_v8 = vpop.permute.xlu1 %295 }
 0x7d4   :  { %v1084_v9 = vmul.f32 %v932_v62, %v296_v8 }
 0x7d6   :  { %v315_v10 = vpack.c.bf16 %v1084_v9, %v1084_v9 }
 0x7d8   :  { %317 = vrot.lane.b32.xlu0 %v315_v10, %s978_s21 }
 0x84a   :  { %v318_v11 = vpop.permute.xlu0 %317 }
 0x84b   :  { %868 = vmatmul.mubr.msk.bf16.vlgmr.msra.gmra.mrb[4].mxu1 %vm43_vm2, %v318_v11 }
 0x84c   :  { %880 = vmatpush3.bf16.msra.mxu1 %v1010_v1  ;;  %883 = vmatprep.mubr.msk.bf16.mxu1 %vm976_vm1, %v975_v0 }
 0x84d   :  { %881 = vmatprep.subr.bf16.mxu1 %v975_v0 }
 0x850   :  { %882 = vmatpush3.bf16.msra.mxu1 %v1025_v2 }
 0x851   :  { %895 = vmatprep.subr.bf16.mxu1 %v975_v0 }
 0x91e   :  { %v356_v14 = vpop.f32.mrb[4].mxu1 }
 0x91f   :  { %v362_v15 = vadd.f32 %v356_v14, %v314_v13  ;;  %v869_v16 = vpop.f32.mrb[5].mxu1 }
 0x920   :  { %v359_v17 = vpop.f32.mrb[6].mxu1 }
 0x921   :  { %935 = vtanh.f32 %v362_v15  ;;  %v870_v18 = vpop.f32.mrb[7].mxu1  ;;  %v797_v20 = vmul.f32 -1.442695, %v362_v15  ;;  %v807_v17 = vld [vmem:[%s1213_s0 + $0x6] sm:$0x1] }
 0x922   :  { %v578_v18 = vunpack.c.l.bf16 %v807_v17 }
 0x923   :  { %937 = vpow2.f32 %v797_v20 }
 0x92b   :  { %v936_v19 = vpop.eup %935 }
 0x92c   :  { %372 = vrot.lane.b32.xlu1 %v936_v19, %s977_s20 }
 0x92d   :  { %v938_v21 = vpop.eup %937 }
 0x92e   :  { %v366_v22 = vadd.f32 1.0, %v938_v21 }
 0x930   :  { %939 = vrcp.f32 %v366_v22 }
 0x93a   :  { %v940_v23 = vpop.eup %939 }
 0x93b   :  { %v370_v27 = vmul.f32 %v940_v23, %v292_v6 }
 0x99e   :  { %v373_v24 = vpop.permute.xlu1 %372 }
 0x99f   :  { %v375_v25 = vmul.f32 %v940_v23, %v373_v24 }
 0x9a1   :  { %377 = vrot.lane.b32.xlu0 %v375_v25, %s978_s21 }
 0xa13   :  { %v378_v28 = vpop.permute.xlu0 %377 }
 0xa14   :  { %v380_v29 = vadd.f32 %v378_v28, %v370_v27 }
 0xa16   :  { %941 = vtanh.f32 %v380_v29 }
 0xa20   :  { %v942_v30 = vpop.eup %941 }
 0xa21   :  { %383 = vrot.lane.b32.xlu1 %v942_v30, %s977_s20 }
 0xa93   :  { %v384_v31 = vpop.permute.xlu1 %383 }
 0xa94   :  { %v1102_v32 = vmul.f32 %v940_v23, %v384_v31 }
 0xa96   :  { %v403_v33 = vpack.c.bf16 %v1102_v32, %v1102_v32 }
 0xa98   :  { %405 = vrot.lane.b32.xlu0 %v403_v33, %s978_s21 }
 0xb0a   :  { %v406_v34 = vpop.permute.xlu0 %405 }
 0xb0b   :  { %876 = vmatmul.mubr.msk.bf16.vlgmr.msra.gmra.mrb[8].mxu0 %vm43_vm2, %v406_v34 }
 0xb0c   :  { %888 = vmatpush3.bf16.msra.mxu0 %v1010_v1  ;;  %891 = vmatprep.mubr.msk.bf16.mxu0 %vm976_vm1, %v975_v0 }
 0xb0d   :  { %889 = vmatprep.subr.bf16.mxu0 %v975_v0 }
 0xb10   :  { %890 = vmatpush3.bf16.msra.mxu0 %v1025_v2 }
 0xbde   :  { %v444_v37 = vpop.f32.mrb[8].mxu0 }
 0xbdf   :  { %v450_v38 = vadd.f32 %v444_v37, %v402_v36  ;;  %v877_v39 = vpop.f32.mrb[9].mxu0 }
 0xbe0   :  { %v447_v40 = vpop.f32.mrb[10].mxu0 }
 0xbe1   :  { %943 = vtanh.f32 %v450_v38  ;;  %v878_v41 = vpop.f32.mrb[11].mxu0  ;;  %v801_v43 = vmul.f32 -1.442695, %v450_v38 }
 0xbe2   :  { %v811_v41 = vld [vmem:[%s1213_s0 + $0x7] sm:$0x1] }
 0xbe3   :  { %945 = vpow2.f32 %v801_v43 }
 0xbeb   :  { %v944_v42 = vpop.eup %943 }
 0xbec   :  { %460 = vrot.lane.b32.xlu1 %v944_v42, %s977_s20  ;;  %v666_v42 = vunpack.c.l.bf16 %v811_v41 }
 0xbed   :  { %v946_v44 = vpop.eup %945 }
 0xbee   :  { %v454_v45 = vadd.f32 1.0, %v946_v44 }
 0xbf0   :  { %947 = vrcp.f32 %v454_v45 }
 0xbfa   :  { %v948_v46 = vpop.eup %947 }
 0xbfb   :  { %v458_v50 = vmul.f32 %v948_v46, %v380_v29 }
 0xc5e   :  { %v461_v47 = vpop.permute.xlu1 %460 }
 0xc5f   :  { %v463_v49 = vmul.f32 %v948_v46, %v461_v47 }
 0xc61   :  { %465 = vrot.lane.b32.xlu0 %v463_v49, %s978_s21 }
 0xcd3   :  { %v466_v51 = vpop.permute.xlu0 %465 }
 0xcd4   :  { %v468_v52 = vadd.f32 %v466_v51, %v458_v50 }
 0xcd6   :  { %949 = vtanh.f32 %v468_v52 }
 0xce0   :  { %v950_v53 = vpop.eup %949 }
 0xce1   :  { %471 = vrot.lane.b32.xlu1 %v950_v53, %s977_s20  ;;  %v979_v53 = vmov 1983009808  }
 0xd53   :  { %v472_v54 = vpop.permute.xlu1 %471 }
 0xd54   :  { %v1119_v55 = vmul.f32 %v948_v46, %v472_v54  ;;  %v125_v54 = vunpack.c.l.s4 %v979_v53 }
 0xd56   :  { %v491_v56 = vpack.c.bf16 %v1119_v55, %v1119_v55 }
 0xd58   :  { %493 = vrot.lane.b32.xlu0 %v491_v56, %s978_s21  ;;  %v127_v56 = vlaneseq }
 0xd5a   :  { %v128_v58 = vshrl.u32 %v127_v56, 7 }
 0xdca   :  { %v494_v57 = vpop.permute.xlu0 %493 }
 0xdcb   :  { %884 = vmatmul.mubr.msk.bf16.vlgmr.msra.gmra.mrb[8].mxu1 %vm43_vm2, %v494_v57  ;;  %v126_v57 = vunpack.c.0.s8 %v125_v54 }
 0xdcc   :  { %896 = vmatpush3.bf16.msra.mxu1 %v1010_v1  ;;  %899 = vmatprep.mubr.msk.bf16.mxu1 %vm976_vm1, %v975_v0 }
 0xdcd   :  { %897 = vmatprep.subr.bf16.mxu1 %v975_v0 }
 0xdd0   :  { %898 = vmatpush3.bf16.msra.mxu1 %v1025_v2 }
 0xe9e   :  { %v532_v60 = vpop.f32.mrb[8].mxu1 }
 0xe9f   :  { %v538_v61 = vadd.f32 %v532_v60, %v490_v59  ;;  %v885_v62 = vpop.f32.mrb[9].mxu1 }
 0xea0   :  { %v535_v63 = vpop.f32.mrb[10].mxu1 }
 0xea1   :  { %951 = vtanh.f32 %v538_v61  ;;  %v886_v3 = vpop.f32.mrb[11].mxu1  ;;  %v805_v1 = vmul.f32 -1.442695, %v538_v61  ;;  %v129_v61 = vsub.s32 %v126_v57, %v128_v58 }
 0xea3   :  { %953 = vpow2.f32 %v805_v1  ;;  %v130_v63 = vrot.slane %v1048_v26, %v129_v61  ;;  %v306_v3 = vrot.slane %v1084_v9, %v129_v61 }
 0xeab   :  { %v952_v4 = vpop.eup %951 }
 0xeac   :  { %548 = vrot.lane.b32.xlu1 %v952_v4, %s977_s20  ;;  %v482_v4 = vrot.slane %v1119_v55, %v129_v61 }
 0xead   :  { %v954_v5 = vpop.eup %953 }
 0xeae   :  { %v542_v0 = vadd.f32 1.0, %v954_v5 }
 0xeb0   :  { %955 = vrcp.f32 %v542_v0 }
 0xeba   :  { %v956_v2 = vpop.eup %955 }
 0xebb   :  { %v546_v8 = vmul.f32 %v956_v2, %v468_v52 }
 0xf1e   :  { %v549_v6 = vpop.permute.xlu1 %548 }
 0xf1f   :  { %v551_v7 = vmul.f32 %v956_v2, %v549_v6 }
 0xf21   :  { %553 = vrot.lane.b32.xlu0 %v551_v7, %s978_s21 }
 0xf93   :  { %v554_v10 = vpop.permute.xlu0 %553 }
 0xf94   :  { %v556_v11 = vadd.f32 %v554_v10, %v546_v8  ;;  %v218_v8 = vrot.slane %v1066_v48, %v129_v61 }
 0xf96   :  { %957 = vtanh.f32 %v556_v11 }
 0xfa0   :  { %v958_v12 = vpop.eup %957 }
 0xfa1   :  { %559 = vrot.lane.b32.xlu1 %v958_v12, %s977_s20 }
0x1013   :  { %v560_v13 = vpop.permute.xlu1 %559 }
0x1014   :  { %v1136_v14 = vmul.f32 %v956_v2, %v560_v13 }
0x1016   :  { %v579_v15 = vpack.c.bf16 %v1136_v14, %v1136_v14  ;;  %v570_v12 = vrot.slane %v1136_v14, %v129_v61 }
0x1018   :  { %581 = vrot.lane.b32.xlu0 %v579_v15, %s978_s21 }
0x108a   :  { %v582_v16 = vpop.permute.xlu0 %581 }
0x108b   :  { %892 = vmatmul.mubr.msk.bf16.vlgmr.msra.gmra.mrb[12].mxu0 %vm43_vm2, %v582_v16 }
0x115e   :  { %v620_v19 = vpop.f32.mrb[12].mxu0 }
0x115f   :  { %v626_v20 = vadd.f32 %v620_v19, %v578_v18  ;;  %v893_v21 = vpop.f32.mrb[13].mxu0 }
0x1160   :  { %v623_v22 = vpop.f32.mrb[14].mxu0 }
0x1161   :  { %959 = vtanh.f32 %v626_v20  ;;  %v894_v23 = vpop.f32.mrb[15].mxu0  ;;  %v809_v25 = vmul.f32 -1.442695, %v626_v20 }
0x1163   :  { %961 = vpow2.f32 %v809_v25 }
0x116b   :  { %v960_v24 = vpop.eup %959 }
0x116c   :  { %636 = vrot.lane.b32.xlu1 %v960_v24, %s977_s20 }
0x116d   :  { %v962_v27 = vpop.eup %961 }
0x116e   :  { %v630_v28 = vadd.f32 1.0, %v962_v27 }
0x1170   :  { %963 = vrcp.f32 %v630_v28 }
0x117a   :  { %v964_v29 = vpop.eup %963 }
0x117b   :  { %v634_v33 = vmul.f32 %v964_v29, %v556_v11  ;;  %v394_v11 = vrot.slane %v1102_v32, %v129_v61 }
0x11de   :  { %v637_v30 = vpop.permute.xlu1 %636 }
0x11df   :  { %v639_v31 = vmul.f32 %v964_v29, %v637_v30 }
0x11e1   :  { %641 = vrot.lane.b32.xlu0 %v639_v31, %s978_s21 }
0x1253   :  { %v642_v34 = vpop.permute.xlu0 %641 }
0x1254   :  { %v644_v35 = vadd.f32 %v642_v34, %v634_v33 }
0x1256   :  { %965 = vtanh.f32 %v644_v35 }
0x1260   :  { %v966_v36 = vpop.eup %965 }
0x1261   :  { %647 = vrot.lane.b32.xlu1 %v966_v36, %s977_s20 }
0x12d3   :  { %v648_v37 = vpop.permute.xlu1 %647 }
0x12d4   :  { %v650_v38 = vmul.f32 %v964_v29, %v648_v37 }
0x12d6   :  { %v667_v39 = vpack.c.bf16 %v650_v38, %v650_v38  ;;  %v658_v1 = vrot.slane %v650_v38, %v129_v61 }
0x12d8   :  { %669 = vrot.lane.b32.xlu0 %v667_v39, %s978_s21 }
0x134a   :  { %v670_v40 = vpop.permute.xlu0 %669 }
0x134b   :  { %900 = vmatmul.mubr.msk.bf16.vlgmr.msra.gmra.mrb[12].mxu1 %vm43_vm2, %v670_v40 }
0x141e   :  { %v708_v43 = vpop.f32.mrb[12].mxu1 }
0x141f   :  { %v714_v44 = vadd.f32 %v708_v43, %v666_v42  ;;  %v901_v45 = vpop.f32.mrb[13].mxu1 }
0x1420   :  { %v711_v46 = vpop.f32.mrb[14].mxu1 }
0x1421   :  { %967 = vtanh.f32 %v714_v44  ;;  %v902_v47 = vpop.f32.mrb[15].mxu1  ;;  %v813_v50 = vmul.f32 -1.442695, %v714_v44 }
0x1423   :  { %969 = vpow2.f32 %v813_v50 }
0x142b   :  { %v968_v49 = vpop.eup %967 }
0x142c   :  { %724 = vrot.lane.b32.xlu1 %v968_v49, %s977_s20 }
0x142d   :  { %v970_v51 = vpop.eup %969 }
0x142e   :  { %v718_v52 = vadd.f32 1.0, %v970_v51 }
0x1430   :  { %971 = vrcp.f32 %v718_v52 }
0x143a   :  { %v972_v59 = vpop.eup %971 }
0x143b   :  { %v722_v5 = vmul.f32 %v972_v59, %v644_v35 }
0x149e   :  { %v725_v60 = vpop.permute.xlu1 %724 }
0x149f   :  { %v727_v62 = vmul.f32 %v972_v59, %v725_v60 }
0x14a1   :  { %729 = vrot.lane.b32.xlu0 %v727_v62, %s978_s21 }
0x14a5   :  { %131 = vrot.lane.b32.xlu0 %v130_v63, %s978_s21 }
0x14a9   :  { %307 = vrot.lane.b32.xlu0 %v306_v3, %s978_s21 }
0x14ad   :  { %483 = vrot.lane.b32.xlu0 %v482_v4, %s978_s21 }
0x14b1   :  { %659 = vrot.lane.b32.xlu0 %v658_v1, %s978_s21 }
0x1513   :  { %v730_v0 = vpop.permute.xlu0 %729 }
0x1514   :  { %v732_v2 = vadd.f32 %v730_v0, %v722_v5 }
0x1516   :  { %973 = vtanh.f32 %v732_v2  ;;  %v760_v6 = vrot.slane %v732_v2, %v129_v61 }
0x1517   :  { %v132_v7 = vpop.permute.xlu0 %131 }
0x1518   :  { %135 = vst.msk [vmem:[%s1214_s2] sm:$0x3] %vm19_vm0, %v132_v7  ;;  %761 = vrot.lane.b32.xlu0 %v760_v6, %s980_s11 }
0x151b   :  { %v308_v26 = vpop.permute.xlu0 %307 }
0x151c   :  { %794 = vst.msk [vmem:[%s1214_s2 + $0x4] sm:$0x3] %vm19_vm0, %v308_v26 }
0x151f   :  { %v484_v9 = vpop.permute.xlu0 %483 }
0x1520   :  { %v974_v55 = vpop.eup %973  ;;  %802 = vst.msk [vmem:[%s1214_s2 + $0x8] sm:$0x3] %vm19_vm0, %v484_v9 }
0x1521   :  { %735 = vrot.lane.b32.xlu1 %v974_v55, %s977_s20 }
0x1523   :  { %v660_v10 = vpop.permute.xlu0 %659 }
0x1524   :  { %810 = vst.msk [vmem:[%s1214_s2 + $0xc] sm:$0x3] %vm19_vm0, %v660_v10 }
0x1525   :  { %219 = vrot.lane.b32.xlu1 %v218_v8, %s978_s21 }
0x1529   :  { %395 = vrot.lane.b32.xlu1 %v394_v11, %s978_s21 }
0x152d   :  { %571 = vrot.lane.b32.xlu1 %v570_v12, %s978_s21 }
0x158a   :  { %v762_v13 = vpop.permute.xlu0 %761 }
0x158b   :  { %764 = vst.msk [vmem:[#allocation3] sm:$0x3] %vm19_vm0, %v762_v13  ;;  %769 = vst.msk [vmem:[%s1215_s4] sm:$0x3] %vm19_vm0, %v762_v13 }
0x1593   :  { %v736_v48 = vpop.permute.xlu1 %735 }
0x1594   :  { %v738_v15 = vmul.f32 %v972_v59, %v736_v48 }
0x1596   :  { %v746_v16 = vrot.slane %v738_v15, %v129_v61 }
0x1597   :  { %v220_v17 = vpop.permute.xlu1 %219 }
0x1598   :  { %790 = vst.msk [vmem:[%s1214_s2 + $0x2] sm:$0x3] %vm19_vm0, %v220_v17  ;;  %747 = vrot.lane.b32.xlu1 %v746_v16, %s978_s21 }
0x159b   :  { %v396_v32 = vpop.permute.xlu1 %395 }
0x159c   :  { %798 = vst.msk [vmem:[%s1214_s2 + $0x6] sm:$0x3] %vm19_vm0, %v396_v32 }
0x159f   :  { %v572_v14 = vpop.permute.xlu1 %571 }
0x15a0   :  { %806 = vst.msk [vmem:[%s1214_s2 + $0xa] sm:$0x3] %vm19_vm0, %v572_v14 }
0x160a   :  { %v748_v18 = vpop.permute.xlu1 %747 }
0x160b   :  { %814 = vst.msk [vmem:[%s1214_s2 + $0xe] sm:$0x3] %vm19_vm0, %v748_v18  ;;  %752 = vst.msk [vmem:[#allocation2] sm:$0x3] %vm19_vm0, %v748_v18 }
0x160c   :  { %768 = vst.msk [vmem:[%s1216_s3] sm:$0x3] %vm19_vm0, %v748_v18 }

</bundles_post_ra>
